<compile_context>
chip_gen: v5e
topology: v5e:2x2
jax: 0.10.0
libtpu: 0.0.40
codegen_flags: <defaults>
</compile_context>

<pallas_src>
import math
from functools import partial

import jax
import jax.numpy as jnp
from jax import lax
from jax.experimental import pallas as pl
from jax.experimental.pallas import tpu as pltpu


# ---------------------------------------------------------------------------
# Fused forward kernel (single grid step, whole batch folded into rows)
# ---------------------------------------------------------------------------

def _layer_norm(x, g, b, eps=1e-5):
    mu = jnp.mean(x, axis=-1, keepdims=True)
    var = jnp.mean((x - mu) ** 2, axis=-1, keepdims=True)
    return (x - mu) * lax.rsqrt(var + eps) * g + b


def fused_forward_kernel(x_ref, pe_ref, emb_w_ref,
                         wqkv_ref, bqkv_ref, wo_ref,
                         w1_ref, b1_ref, w2_ref,
                         vec_ref, out_w_ref, out_b_ref,
                         o_ref, *, nlayers, nhead, batch, seq_total):
    """Whole TransformerModel forward, batch folded into rows.

    x_ref:     [BT, Din]  f32   (src + zero decoder tail, batch-major rows)
    pe_ref:    [BT, D]    f32   (positional encoding + embedding bias, tiled)
    emb_w_ref: [Din, D]   bf16
    wqkv_ref:  [L, D, 3D] bf16  (1/sqrt(Dh) folded into the Q columns)
    bqkv_ref:  [L, 1, 3D] f32   (scale folded into the Q part)
    wo_ref:    [L, D, D]  bf16
    w1_ref:    [L, D, H]  bf16   b1_ref: [L, 1, H] f32
    w2_ref:    [L, H, D]  bf16
    vec_ref:   [L, 6, D]  f32   rows = (bo, b2, ln1g, ln1b, ln2g, ln2b)
    out_w_ref: [D, O_pad] bf16   out_b_ref: [1, O_pad] f32
    o_ref:     [BT, O_pad] f32  (lane-dense; wrapper strips padding / tail)
    """
    f32 = jnp.float32
    bf16 = jnp.bfloat16
    T = seq_total
    B = batch
    D = emb_w_ref.shape[1]
    Dh = D // nhead

    # embedding linear + positional encoding (dropout == identity in eval)
    h = jnp.dot(x_ref[...].astype(bf16), emb_w_ref[...],
                preferred_element_type=f32) + pe_ref[...]            # [BT, D]

    for l in range(nlayers):                       # static (nlayers small)
        vecs = vec_ref[l]                          # [6, D]
        bo, b2 = vecs[0:1, :], vecs[1:2, :]
        ln1g, ln1b = vecs[2:3, :], vecs[3:4, :]
        ln2g, ln2b = vecs[4:5, :], vecs[5:6, :]

        # ---- fused QKV projection (one MXU pass, N = 3D) ----
        qkv = jnp.dot(h.astype(bf16), wqkv_ref[l],
                      preferred_element_type=f32) + bqkv_ref[l]      # [BT, 3D]

        # ---- per-batch / per-head attention (T x T scores stay in-batch) ----
        outs_b = []
        for b in range(B):                         # static
            r0 = b * T
            qb = qkv[r0:r0 + T, 0:D]
            kb = qkv[r0:r0 + T, D:2 * D]
            vb = qkv[r0:r0 + T, 2 * D:3 * D]
            head_outs = []
            for hd in range(nhead):                # static
                c0 = hd * Dh
                q = qb[:, c0:c0 + Dh]              # already scaled by 1/sqrt(Dh)
                k = kb[:, c0:c0 + Dh]
                v = vb[:, c0:c0 + Dh]
                s = lax.dot_general(q.astype(bf16), k.astype(bf16),
                                    (((1,), (1,)), ((), ())),
                                    preferred_element_type=f32)      # [T, T]
                s = s - jnp.max(s, axis=-1, keepdims=True)
                p = jnp.exp(s)
                p = p * pl.reciprocal(jnp.sum(p, axis=-1, keepdims=True),
                                      approx=True)
                head_outs.append(jnp.dot(p.astype(bf16), v.astype(bf16),
                                         preferred_element_type=f32))  # [T, Dh]
            outs_b.append(jnp.concatenate(head_outs, axis=-1))          # [T, D]
        attn = jnp.concatenate(outs_b, axis=0)                          # [BT, D]

        # ---- single output projection over all heads (K = D) ----
        attn = jnp.dot(attn.astype(bf16), wo_ref[l],
                       preferred_element_type=f32) + bo

        # ---- add & norm 1 ----
        h = _layer_norm(h + attn, ln1g, ln1b)

        # ---- feed-forward (ReLU) ----
        f = jnp.maximum(
            jnp.dot(h.astype(bf16), w1_ref[l],
                    preferred_element_type=f32) + b1_ref[l], 0.0)
        f = jnp.dot(f.astype(bf16), w2_ref[l],
                    preferred_element_type=f32) + b2

        # ---- add & norm 2 ----
        h = _layer_norm(h + f, ln2g, ln2b)

    # ---- output projection (all rows; wrapper slices trailing positions) ----
    out = jnp.dot(h.astype(bf16), out_w_ref[...],
                  preferred_element_type=f32) + out_b_ref[...]
    o_ref[...] = out                                                   # [BT, O_pad]


# ---------------------------------------------------------------------------
# Parameters & positional encoding (deterministic, in-script, torch layout)
# ---------------------------------------------------------------------------

def make_pe(max_len, d_model):
    position = jnp.arange(max_len, dtype=jnp.float32)[:, None]
    div_term = jnp.exp(jnp.arange(0, d_model, 2, dtype=jnp.float32)
                       * (-math.log(10000.0) / d_model))
    pe = jnp.zeros((max_len, d_model), jnp.float32)
    pe = pe.at[:, 0::2].set(jnp.sin(position * div_term))
    pe = pe.at[:, 1::2].set(jnp.cos(position * div_term))
    return pe


def init_params(key, input_dim, d_model, nhead, d_hid, nlayers, output_dim,
                max_len=128):
    initrange = 0.1

    def u(k, shape, scale):
        return jax.random.uniform(k, shape, jnp.float32, -scale, scale)

    keys = iter(jax.random.split(key, 4 + 8 * nlayers))
    params = {
        'emb_w': u(next(keys), (d_model, input_dim), initrange),
        'emb_b': jnp.zeros((1, d_model), jnp.float32),
        'out_w': u(next(keys), (output_dim, d_model), initrange),   # init_weights()
        'out_b': jnp.zeros((1, output_dim), jnp.float32),           # init_weights()
        'pe': make_pe(max_len, d_model),
        'layers': [],
    }
    lw = 1.0 / math.sqrt(d_model)
    for _ in range(nlayers):
        params['layers'].append({
            'wqkv': u(next(keys), (3 * d_model, d_model), lw),
            'bqkv': jnp.zeros((1, 3 * d_model), jnp.float32),
            'wo': u(next(keys), (d_model, d_model), lw),
            'bo': jnp.zeros((1, d_model), jnp.float32),
            'w1': u(next(keys), (d_hid, d_model), lw),
            'b1': jnp.zeros((1, d_hid), jnp.float32),
            'w2': u(next(keys), (d_model, d_hid), 1.0 / math.sqrt(d_hid)),
            'b2': jnp.zeros((1, d_model), jnp.float32),
            'ln1g': jnp.ones((1, d_model), jnp.float32),
            'ln1b': jnp.zeros((1, d_model), jnp.float32),
            'ln2g': jnp.ones((1, d_model), jnp.float32),
            'ln2b': jnp.zeros((1, d_model), jnp.float32),
        })
    return params


def prepare_kernel_params(params, nhead):
    """One-time (init-time) repack: transpose to x@W layout, fuse QKV, fold the
    attention scale into Wq/bq, pack biases+LN params, pad output lanes, cast
    matmul weights to bf16."""
    D = params['emb_w'].shape[0]
    Dh = D // nhead
    O = params['out_w'].shape[0]
    O_pad = ((O + 127) // 128) * 128
    scale = 1.0 / math.sqrt(Dh)
    layers = params['layers']
    bf16 = jnp.bfloat16

    def stack(fn):
        return jnp.stack([fn(p) for p in layers], axis=0)

    def qkv_w(p):                       # torch [3D, D] (x @ W.T) -> [D, 3D]
        w = p['wqkv'].T
        return jnp.concatenate([w[:, :D] * scale, w[:, D:]], axis=1)

    def qkv_b(p):                       # [1, 3D], scale folded into Q part
        b = p['bqkv']
        return jnp.concatenate([b[:, :D] * scale, b[:, D:]], axis=1)

    vecs = stack(lambda p: jnp.concatenate(
        [p['bo'], p['b2'], p['ln1g'], p['ln1b'], p['ln2g'], p['ln2b']],
        axis=0))                                                    # [L, 6, D]

    out_w = jnp.pad(params['out_w'].T, ((0, 0), (0, O_pad - O)))    # [D, O_pad]
    out_b = jnp.pad(params['out_b'], ((0, 0), (0, O_pad - O)))

    return dict(
        emb_w=params['emb_w'].T.astype(bf16),          # [Din, D]
        pe_embb=params['pe'] + params['emb_b'],        # [max_len, D] (bias folded)
        wqkv=stack(qkv_w).astype(bf16),                # [L, D, 3D]
        bqkv=stack(qkv_b),                             # [L, 1, 3D]
        wo=stack(lambda p: p['wo'].T).astype(bf16),    # [L, D, D]
        w1=stack(lambda p: p['w1'].T).astype(bf16),    # [L, D, d_hid]
        b1=stack(lambda p: p['b1']),                   # [L, 1, d_hid]
        w2=stack(lambda p: p['w2'].T).astype(bf16),    # [L, d_hid, D]
        vecs=vecs,                                     # [L, 6, D]
        out_w=out_w.astype(bf16),                      # [D, O_pad]
        out_b=out_b,                                   # [1, O_pad]
        out_dim=O,
        num_layers=len(layers),
    )


# ---------------------------------------------------------------------------
# Forward pass: single fused pallas_call (one grid step, batch folded in rows)
# ---------------------------------------------------------------------------

def transformer_forward(src, target_length, kp, nhead):
    """src: [S, B, Din] (PyTorch seq-first). Returns ([target_length, B, O], None)."""
    S, B, Din = src.shape
    T = S + target_length
    BT = B * T
    D = kp['emb_w'].shape[1]
    O = kp['out_dim']
    O_pad = kp['out_w'].shape[1]
    L = kp['num_layers']

    # cat([src, zeros]) along seq, batch-major, fold batch into rows
    x = jnp.transpose(src, (1, 0, 2))                                  # [B, S, Din]
    x = jnp.concatenate(
        [x, jnp.zeros((B, target_length, Din), src.dtype)], axis=1)    # [B, T, Din]
    x = x.reshape(BT, Din)

    pe = jnp.tile(kp['pe_embb'][:T], (B, 1))                           # [BT, D]

    # TODO(synk): dropout (p=0.1 PositionalEncoding, p=0.5 encoder layers) is
    # stochastic training-time behaviour; modeled as identity (eval mode).

    operands = [x, pe, kp['emb_w'], kp['wqkv'], kp['bqkv'], kp['wo'],
                kp['w1'], kp['b1'], kp['w2'], kp['vecs'],
                kp['out_w'], kp['out_b']]

    # explicit VMEM budget from the actual operand + output footprint
    foot = sum(int(a.size) * a.dtype.itemsize for a in operands)
    foot += BT * O_pad * 4
    vmem_limit = int(min(128 * 1024 * 1024, max(32 * 1024 * 1024, 4 * foot)))

    def full_spec(a):
        nd = a.ndim
        return pl.BlockSpec(a.shape, lambda i, _nd=nd: (0,) * _nd)

    out = pl.pallas_call(
        partial(fused_forward_kernel, nlayers=L, nhead=nhead,
                batch=B, seq_total=T),
        out_shape=jax.ShapeDtypeStruct((BT, O_pad), jnp.float32),
        grid=(1,),                                   # single step: every operand DMA'd once
        in_specs=[full_spec(a) for a in operands],
        out_specs=pl.BlockSpec((BT, O_pad), lambda i: (0, 0)),
        compiler_params=pltpu.CompilerParams(
            dimension_semantics=("arbitrary",),
            vmem_limit_bytes=vmem_limit),
    )(*operands)

    out = out.reshape(B, T, O_pad)[:, S:, :O]        # strip lane pad, keep tail
    out = jnp.transpose(out, (1, 0, 2))              # [target_length, B, O]
    return out, None


# ---------------------------------------------------------------------------
# Pure-JAX reference (f32, same math, no Pallas) for verification
# ---------------------------------------------------------------------------

def _ln_ref(x, g, b, eps=1e-5):
    mu = jnp.mean(x, axis=-1, keepdims=True)
    var = jnp.mean((x - mu) ** 2, axis=-1, keepdims=True)
    return (x - mu) / jnp.sqrt(var + eps) * g + b


def ref_forward(src, target_length, params, nhead):
    S, B, Din = src.shape
    T = S + target_length
    D = params['emb_w'].shape[0]
    Dh = D // nhead
    x = jnp.concatenate(
        [src, jnp.zeros((target_length, B, Din), jnp.float32)], axis=0)
    h = jnp.einsum('tbi,di->tbd', x, params['emb_w']) + params['emb_b'][0]
    h = h + params['pe'][:T][:, None, :]
    h = jnp.transpose(h, (1, 0, 2))                                    # [B, T, D]
    for p in params['layers']:
        qkv = jnp.einsum('bsd,ed->bse', h, p['wqkv']) + p['bqkv'][0]
        q, k, v = qkv[..., :D], qkv[..., D:2 * D], qkv[..., 2 * D:]
        split = lambda t: t.reshape(B, T, nhead, Dh).transpose(0, 2, 1, 3)
        qh, kh, vh = split(q), split(k), split(v)
        s = jnp.einsum('bhqd,bhkd->bhqk', qh, kh) / math.sqrt(Dh)
        a = jax.nn.softmax(s, axis=-1)
        o = jnp.einsum('bhqk,bhkd->bhqd', a, vh)
        o = o.transpose(0, 2, 1, 3).reshape(B, T, D)
        o = jnp.einsum('bsd,ed->bse', o, p['wo']) + p['bo'][0]
        h = _ln_ref(h + o, p['ln1g'][0], p['ln1b'][0])
        f = jax.nn.relu(jnp.einsum('bsd,hd->bsh', h, p['w1']) + p['b1'][0])
        f = jnp.einsum('bsh,dh->bsd', f, p['w2']) + p['b2'][0]
        h = _ln_ref(h + f, p['ln2g'][0], p['ln2b'][0])
    out = jnp.einsum('bsd,od->bso', h, params['out_w']) + params['out_b'][0]
    return jnp.transpose(out, (1, 0, 2))[S:]


# ---------------------------------------------------------------------------

if __name__ == "__main__":
    key = jax.random.PRNGKey(0)
    S, B, Din = 8, 2, 8                 # seq_len, batch, input feature dim
    d_model, nhead, d_hid = 32, 2, 64
    nlayers, output_dim = 2, 4
    target_length = 4

    pkey, xkey = jax.random.split(key)
    params = init_params(pkey, Din, d_model, nhead, d_hid, nlayers, output_dim)
    kparams = prepare_kernel_params(params, nhead)     # hoisted: runs once at init
    src = jax.random.normal(xkey, (S, B, Din), jnp.float32)

    out, _ = transformer_forward(src, target_length, kparams, nhead)
    out = jax.block_until_ready(out)
    assert out.shape == (target_length, B, output_dim), out.shape

    ref = ref_forward(src, target_length, params, nhead)
    err = float(jnp.max(jnp.abs(out - ref)))
    # bf16 matmul operands (+ approx EUP reciprocal in the softmax) vs. the
    # exact f32 reference -> ~1e-2-level deviations expected at these sizes.
    assert jnp.allclose(out, ref, atol=1e-1, rtol=1e-1), err

    print("KERNEL_OK")
</pallas_src>

<mosaic_0001>
module attributes {stable_mosaic.version = 11 : i64} {
  func.func @fused_forward_kernel(%arg0: i32, %arg1: memref<24x8xf32, #tpu.memory_space<vmem>>, %arg2: memref<24x32xf32, #tpu.memory_space<vmem>>, %arg3: memref<8x32xbf16, #tpu.memory_space<vmem>>, %arg4: memref<2x32x96xbf16, #tpu.memory_space<vmem>>, %arg5: memref<2x1x96xf32, #tpu.memory_space<vmem>>, %arg6: memref<2x32x32xbf16, #tpu.memory_space<vmem>>, %arg7: memref<2x32x64xbf16, #tpu.memory_space<vmem>>, %arg8: memref<2x1x64xf32, #tpu.memory_space<vmem>>, %arg9: memref<2x64x32xbf16, #tpu.memory_space<vmem>>, %arg10: memref<2x6x32xf32, #tpu.memory_space<vmem>>, %arg11: memref<32x128xbf16, #tpu.memory_space<vmem>>, %arg12: memref<1x128xf32, #tpu.memory_space<vmem>>, %arg13: memref<24x128xf32, #tpu.memory_space<vmem>>) attributes {dimension_semantics = [#tpu.dimension_semantics<arbitrary>], iteration_bounds = array<i64: 1>, scalar_prefetch = 0 : i64, scratch_operands = 0 : i64, tpu.core_type = #tpu.core_type<tc>, window_params = [{pipeline_mode = #tpu.pipeline_mode<synchronous>, transform_indices = @transform_0, window_bounds = array<i64: 24, 8>}, {pipeline_mode = #tpu.pipeline_mode<synchronous>, transform_indices = @transform_1, window_bounds = array<i64: 24, 32>}, {pipeline_mode = #tpu.pipeline_mode<synchronous>, transform_indices = @transform_2, window_bounds = array<i64: 8, 32>}, {pipeline_mode = #tpu.pipeline_mode<synchronous>, transform_indices = @transform_3, window_bounds = array<i64: 2, 32, 96>}, {pipeline_mode = #tpu.pipeline_mode<synchronous>, transform_indices = @transform_4, window_bounds = array<i64: 2, 1, 96>}, {pipeline_mode = #tpu.pipeline_mode<synchronous>, transform_indices = @transform_5, window_bounds = array<i64: 2, 32, 32>}, {pipeline_mode = #tpu.pipeline_mode<synchronous>, transform_indices = @transform_6, window_bounds = array<i64: 2, 32, 64>}, {pipeline_mode = #tpu.pipeline_mode<synchronous>, transform_indices = @transform_7, window_bounds = array<i64: 2, 1, 64>}, {pipeline_mode = #tpu.pipeline_mode<synchronous>, transform_indices = @transform_8, window_bounds = array<i64: 2, 64, 32>}, {pipeline_mode = #tpu.pipeline_mode<synchronous>, transform_indices = @transform_9, window_bounds = array<i64: 2, 6, 32>}, {pipeline_mode = #tpu.pipeline_mode<synchronous>, transform_indices = @transform_10, window_bounds = array<i64: 32, 128>}, {pipeline_mode = #tpu.pipeline_mode<synchronous>, transform_indices = @transform_11, window_bounds = array<i64: 1, 128>}, {pipeline_mode = #tpu.pipeline_mode<synchronous>, transform_indices = @transform_12, window_bounds = array<i64: 24, 128>}]} {
    %c0 = arith.constant 0 : index
    %c0_0 = arith.constant 0 : index
    %0 = vector.load %arg1[%c0, %c0_0] : memref<24x8xf32, #tpu.memory_space<vmem>>, vector<24x8xf32>
    %1 = arith.truncf %0 : vector<24x8xf32> to vector<24x8xbf16>
    %c0_1 = arith.constant 0 : index
    %c0_2 = arith.constant 0 : index
    %2 = vector.load %arg3[%c0_1, %c0_2] : memref<8x32xbf16, #tpu.memory_space<vmem>>, vector<8x32xbf16>
    %cst = arith.constant dense<0.000000e+00> : vector<24x32xf32>
    %3 = tpu.matmul %1, %2, %cst {dimension_numbers = #tpu.dot_dimension_numbers<[1], [0], [0], [1], [0, 0, 1, 1], [], []>} : vector<24x8xbf16>, vector<8x32xbf16>, vector<24x32xf32> -> vector<24x32xf32>
    %c0_3 = arith.constant 0 : index
    %c0_4 = arith.constant 0 : index
    %4 = vector.load %arg2[%c0_3, %c0_4] : memref<24x32xf32, #tpu.memory_space<vmem>>, vector<24x32xf32>
    %5 = arith.addf %3, %4 : vector<24x32xf32>
    %c0_5 = arith.constant 0 : index
    %c0_6 = arith.constant 0 : index
    %c0_7 = arith.constant 0 : index
    %6 = vector.load %arg10[%c0_5, %c0_6, %c0_7] : memref<2x6x32xf32, #tpu.memory_space<vmem>>, vector<1x6x32xf32>
    %7 = vector.shape_cast %6 : vector<1x6x32xf32> to vector<6x32xf32>
    %8 = vector.extract_strided_slice %7 {offsets = [0, 0], sizes = [1, 32], strides = [1, 1]} : vector<6x32xf32> to vector<1x32xf32>
    %9 = vector.extract_strided_slice %7 {offsets = [1, 0], sizes = [1, 32], strides = [1, 1]} : vector<6x32xf32> to vector<1x32xf32>
    %10 = vector.extract_strided_slice %7 {offsets = [2, 0], sizes = [1, 32], strides = [1, 1]} : vector<6x32xf32> to vector<1x32xf32>
    %11 = vector.extract_strided_slice %7 {offsets = [3, 0], sizes = [1, 32], strides = [1, 1]} : vector<6x32xf32> to vector<1x32xf32>
    %12 = vector.extract_strided_slice %7 {offsets = [4, 0], sizes = [1, 32], strides = [1, 1]} : vector<6x32xf32> to vector<1x32xf32>
    %13 = vector.extract_strided_slice %7 {offsets = [5, 0], sizes = [1, 32], strides = [1, 1]} : vector<6x32xf32> to vector<1x32xf32>
    %14 = arith.truncf %5 : vector<24x32xf32> to vector<24x32xbf16>
    %c0_8 = arith.constant 0 : index
    %c0_9 = arith.constant 0 : index
    %c0_10 = arith.constant 0 : index
    %15 = vector.load %arg4[%c0_8, %c0_9, %c0_10] : memref<2x32x96xbf16, #tpu.memory_space<vmem>>, vector<1x32x96xbf16>
    %16 = vector.shape_cast %15 : vector<1x32x96xbf16> to vector<32x96xbf16>
    %cst_11 = arith.constant dense<0.000000e+00> : vector<24x96xf32>
    %17 = tpu.matmul %14, %16, %cst_11 {dimension_numbers = #tpu.dot_dimension_numbers<[1], [0], [0], [1], [0, 0, 1, 1], [], []>} : vector<24x32xbf16>, vector<32x96xbf16>, vector<24x96xf32> -> vector<24x96xf32>
    %c0_12 = arith.constant 0 : index
    %c0_13 = arith.constant 0 : index
    %c0_14 = arith.constant 0 : index
    %18 = vector.load %arg5[%c0_12, %c0_13, %c0_14] : memref<2x1x96xf32, #tpu.memory_space<vmem>>, vector<1x1x96xf32>
    %19 = vector.shape_cast %18 : vector<1x1x96xf32> to vector<1x96xf32>
    %20 = vector.broadcast %19 : vector<1x96xf32> to vector<24x96xf32>
    %21 = arith.addf %17, %20 : vector<24x96xf32>
    %22 = vector.extract_strided_slice %21 {offsets = [0, 0], sizes = [12, 32], strides = [1, 1]} : vector<24x96xf32> to vector<12x32xf32>
    %23 = vector.extract_strided_slice %21 {offsets = [0, 32], sizes = [12, 32], strides = [1, 1]} : vector<24x96xf32> to vector<12x32xf32>
    %24 = vector.extract_strided_slice %21 {offsets = [0, 64], sizes = [12, 32], strides = [1, 1]} : vector<24x96xf32> to vector<12x32xf32>
    %25 = vector.extract_strided_slice %22 {offsets = [0, 0], sizes = [12, 16], strides = [1, 1]} : vector<12x32xf32> to vector<12x16xf32>
    %26 = vector.extract_strided_slice %23 {offsets = [0, 0], sizes = [12, 16], strides = [1, 1]} : vector<12x32xf32> to vector<12x16xf32>
    %27 = vector.extract_strided_slice %24 {offsets = [0, 0], sizes = [12, 16], strides = [1, 1]} : vector<12x32xf32> to vector<12x16xf32>
    %28 = arith.truncf %25 : vector<12x16xf32> to vector<12x16xbf16>
    %29 = arith.truncf %26 : vector<12x16xf32> to vector<12x16xbf16>
    %cst_15 = arith.constant dense<0.000000e+00> : vector<12x12xf32>
    %30 = tpu.matmul %28, %29, %cst_15 {dimension_numbers = #tpu.dot_dimension_numbers<[1], [1], [0], [0], [0, 0, 1, 0], [], []>} : vector<12x16xbf16>, vector<12x16xbf16>, vector<12x12xf32> -> vector<12x12xf32>
    %cst_16 = arith.constant dense<0xFF800000> : vector<12xf32>
    %31 = vector.multi_reduction <maximumf>, %30, %cst_16 [1] : vector<12x12xf32> to vector<12xf32>
    %32 = vector.shape_cast %31 : vector<12xf32> to vector<12x1xf32>
    %33 = vector.broadcast %32 : vector<12x1xf32> to vector<12x12xf32>
    %34 = arith.subf %30, %33 : vector<12x12xf32>
    %35 = math.exp %34 : vector<12x12xf32>
    %cst_17 = arith.constant dense<0.000000e+00> : vector<12xf32>
    %36 = vector.multi_reduction <add>, %35, %cst_17 [1] : vector<12x12xf32> to vector<12xf32>
    %37 = vector.shape_cast %36 : vector<12xf32> to vector<12x1xf32>
    %38 = tpu.reciprocal %37 {approx = true} : vector<12x1xf32> -> vector<12x1xf32>
    %39 = vector.broadcast %38 : vector<12x1xf32> to vector<12x12xf32>
    %40 = arith.mulf %35, %39 : vector<12x12xf32>
    %41 = arith.truncf %40 : vector<12x12xf32> to vector<12x12xbf16>
    %42 = arith.truncf %27 : vector<12x16xf32> to vector<12x16xbf16>
    %cst_18 = arith.constant dense<0.000000e+00> : vector<12x16xf32>
    %43 = tpu.matmul %41, %42, %cst_18 {dimension_numbers = #tpu.dot_dimension_numbers<[1], [0], [0], [1], [0, 0, 1, 1], [], []>} : vector<12x12xbf16>, vector<12x16xbf16>, vector<12x16xf32> -> vector<12x16xf32>
    %44 = vector.extract_strided_slice %22 {offsets = [0, 16], sizes = [12, 16], strides = [1, 1]} : vector<12x32xf32> to vector<12x16xf32>
    %45 = vector.extract_strided_slice %23 {offsets = [0, 16], sizes = [12, 16], strides = [1, 1]} : vector<12x32xf32> to vector<12x16xf32>
    %46 = vector.extract_strided_slice %24 {offsets = [0, 16], sizes = [12, 16], strides = [1, 1]} : vector<12x32xf32> to vector<12x16xf32>
    %47 = arith.truncf %44 : vector<12x16xf32> to vector<12x16xbf16>
    %48 = arith.truncf %45 : vector<12x16xf32> to vector<12x16xbf16>
    %cst_19 = arith.constant dense<0.000000e+00> : vector<12x12xf32>
    %49 = tpu.matmul %47, %48, %cst_19 {dimension_numbers = #tpu.dot_dimension_numbers<[1], [1], [0], [0], [0, 0, 1, 0], [], []>} : vector<12x16xbf16>, vector<12x16xbf16>, vector<12x12xf32> -> vector<12x12xf32>
    %cst_20 = arith.constant dense<0xFF800000> : vector<12xf32>
    %50 = vector.multi_reduction <maximumf>, %49, %cst_20 [1] : vector<12x12xf32> to vector<12xf32>
    %51 = vector.shape_cast %50 : vector<12xf32> to vector<12x1xf32>
    %52 = vector.broadcast %51 : vector<12x1xf32> to vector<12x12xf32>
    %53 = arith.subf %49, %52 : vector<12x12xf32>
    %54 = math.exp %53 : vector<12x12xf32>
    %cst_21 = arith.constant dense<0.000000e+00> : vector<12xf32>
    %55 = vector.multi_reduction <add>, %54, %cst_21 [1] : vector<12x12xf32> to vector<12xf32>
    %56 = vector.shape_cast %55 : vector<12xf32> to vector<12x1xf32>
    %57 = tpu.reciprocal %56 {approx = true} : vector<12x1xf32> -> vector<12x1xf32>
    %58 = vector.broadcast %57 : vector<12x1xf32> to vector<12x12xf32>
    %59 = arith.mulf %54, %58 : vector<12x12xf32>
    %60 = arith.truncf %59 : vector<12x12xf32> to vector<12x12xbf16>
    %61 = arith.truncf %46 : vector<12x16xf32> to vector<12x16xbf16>
    %cst_22 = arith.constant dense<0.000000e+00> : vector<12x16xf32>
    %62 = tpu.matmul %60, %61, %cst_22 {dimension_numbers = #tpu.dot_dimension_numbers<[1], [0], [0], [1], [0, 0, 1, 1], [], []>} : vector<12x12xbf16>, vector<12x16xbf16>, vector<12x16xf32> -> vector<12x16xf32>
    %63 = tpu.concatenate %43, %62 in 1 : vector<12x16xf32>, vector<12x16xf32> -> vector<12x32xf32>
    %64 = vector.extract_strided_slice %21 {offsets = [12, 0], sizes = [12, 32], strides = [1, 1]} : vector<24x96xf32> to vector<12x32xf32>
    %65 = vector.extract_strided_slice %21 {offsets = [12, 32], sizes = [12, 32], strides = [1, 1]} : vector<24x96xf32> to vector<12x32xf32>
    %66 = vector.extract_strided_slice %21 {offsets = [12, 64], sizes = [12, 32], strides = [1, 1]} : vector<24x96xf32> to vector<12x32xf32>
    %67 = vector.extract_strided_slice %64 {offsets = [0, 0], sizes = [12, 16], strides = [1, 1]} : vector<12x32xf32> to vector<12x16xf32>
    %68 = vector.extract_strided_slice %65 {offsets = [0, 0], sizes = [12, 16], strides = [1, 1]} : vector<12x32xf32> to vector<12x16xf32>
    %69 = vector.extract_strided_slice %66 {offsets = [0, 0], sizes = [12, 16], strides = [1, 1]} : vector<12x32xf32> to vector<12x16xf32>
    %70 = arith.truncf %67 : vector<12x16xf32> to vector<12x16xbf16>
    %71 = arith.truncf %68 : vector<12x16xf32> to vector<12x16xbf16>
    %cst_23 = arith.constant dense<0.000000e+00> : vector<12x12xf32>
    %72 = tpu.matmul %70, %71, %cst_23 {dimension_numbers = #tpu.dot_dimension_numbers<[1], [1], [0], [0], [0, 0, 1, 0], [], []>} : vector<12x16xbf16>, vector<12x16xbf16>, vector<12x12xf32> -> vector<12x12xf32>
    %cst_24 = arith.constant dense<0xFF800000> : vector<12xf32>
    %73 = vector.multi_reduction <maximumf>, %72, %cst_24 [1] : vector<12x12xf32> to vector<12xf32>
    %74 = vector.shape_cast %73 : vector<12xf32> to vector<12x1xf32>
    %75 = vector.broadcast %74 : vector<12x1xf32> to vector<12x12xf32>
    %76 = arith.subf %72, %75 : vector<12x12xf32>
    %77 = math.exp %76 : vector<12x12xf32>
    %cst_25 = arith.constant dense<0.000000e+00> : vector<12xf32>
    %78 = vector.multi_reduction <add>, %77, %cst_25 [1] : vector<12x12xf32> to vector<12xf32>
    %79 = vector.shape_cast %78 : vector<12xf32> to vector<12x1xf32>
    %80 = tpu.reciprocal %79 {approx = true} : vector<12x1xf32> -> vector<12x1xf32>
    %81 = vector.broadcast %80 : vector<12x1xf32> to vector<12x12xf32>
    %82 = arith.mulf %77, %81 : vector<12x12xf32>
    %83 = arith.truncf %82 : vector<12x12xf32> to vector<12x12xbf16>
    %84 = arith.truncf %69 : vector<12x16xf32> to vector<12x16xbf16>
    %cst_26 = arith.constant dense<0.000000e+00> : vector<12x16xf32>
    %85 = tpu.matmul %83, %84, %cst_26 {dimension_numbers = #tpu.dot_dimension_numbers<[1], [0], [0], [1], [0, 0, 1, 1], [], []>} : vector<12x12xbf16>, vector<12x16xbf16>, vector<12x16xf32> -> vector<12x16xf32>
    %86 = vector.extract_strided_slice %64 {offsets = [0, 16], sizes = [12, 16], strides = [1, 1]} : vector<12x32xf32> to vector<12x16xf32>
    %87 = vector.extract_strided_slice %65 {offsets = [0, 16], sizes = [12, 16], strides = [1, 1]} : vector<12x32xf32> to vector<12x16xf32>
    %88 = vector.extract_strided_slice %66 {offsets = [0, 16], sizes = [12, 16], strides = [1, 1]} : vector<12x32xf32> to vector<12x16xf32>
    %89 = arith.truncf %86 : vector<12x16xf32> to vector<12x16xbf16>
    %90 = arith.truncf %87 : vector<12x16xf32> to vector<12x16xbf16>
    %cst_27 = arith.constant dense<0.000000e+00> : vector<12x12xf32>
    %91 = tpu.matmul %89, %90, %cst_27 {dimension_numbers = #tpu.dot_dimension_numbers<[1], [1], [0], [0], [0, 0, 1, 0], [], []>} : vector<12x16xbf16>, vector<12x16xbf16>, vector<12x12xf32> -> vector<12x12xf32>
    %cst_28 = arith.constant dense<0xFF800000> : vector<12xf32>
    %92 = vector.multi_reduction <maximumf>, %91, %cst_28 [1] : vector<12x12xf32> to vector<12xf32>
    %93 = vector.shape_cast %92 : vector<12xf32> to vector<12x1xf32>
    %94 = vector.broadcast %93 : vector<12x1xf32> to vector<12x12xf32>
    %95 = arith.subf %91, %94 : vector<12x12xf32>
    %96 = math.exp %95 : vector<12x12xf32>
    %cst_29 = arith.constant dense<0.000000e+00> : vector<12xf32>
    %97 = vector.multi_reduction <add>, %96, %cst_29 [1] : vector<12x12xf32> to vector<12xf32>
    %98 = vector.shape_cast %97 : vector<12xf32> to vector<12x1xf32>
    %99 = tpu.reciprocal %98 {approx = true} : vector<12x1xf32> -> vector<12x1xf32>
    %100 = vector.broadcast %99 : vector<12x1xf32> to vector<12x12xf32>
    %101 = arith.mulf %96, %100 : vector<12x12xf32>
    %102 = arith.truncf %101 : vector<12x12xf32> to vector<12x12xbf16>
    %103 = arith.truncf %88 : vector<12x16xf32> to vector<12x16xbf16>
    %cst_30 = arith.constant dense<0.000000e+00> : vector<12x16xf32>
    %104 = tpu.matmul %102, %103, %cst_30 {dimension_numbers = #tpu.dot_dimension_numbers<[1], [0], [0], [1], [0, 0, 1, 1], [], []>} : vector<12x12xbf16>, vector<12x16xbf16>, vector<12x16xf32> -> vector<12x16xf32>
    %105 = tpu.concatenate %85, %104 in 1 : vector<12x16xf32>, vector<12x16xf32> -> vector<12x32xf32>
    %106 = tpu.concatenate %63, %105 in 0 : vector<12x32xf32>, vector<12x32xf32> -> vector<24x32xf32>
    %107 = arith.truncf %106 : vector<24x32xf32> to vector<24x32xbf16>
    %c0_31 = arith.constant 0 : index
    %c0_32 = arith.constant 0 : index
    %c0_33 = arith.constant 0 : index
    %108 = vector.load %arg6[%c0_31, %c0_32, %c0_33] : memref<2x32x32xbf16, #tpu.memory_space<vmem>>, vector<1x32x32xbf16>
    %109 = vector.shape_cast %108 : vector<1x32x32xbf16> to vector<32x32xbf16>
    %cst_34 = arith.constant dense<0.000000e+00> : vector<24x32xf32>
    %110 = tpu.matmul %107, %109, %cst_34 {dimension_numbers = #tpu.dot_dimension_numbers<[1], [0], [0], [1], [0, 0, 1, 1], [], []>} : vector<24x32xbf16>, vector<32x32xbf16>, vector<24x32xf32> -> vector<24x32xf32>
    %111 = vector.broadcast %8 : vector<1x32xf32> to vector<24x32xf32>
    %112 = arith.addf %110, %111 : vector<24x32xf32>
    %113 = arith.addf %5, %112 : vector<24x32xf32>
    %cst_35 = arith.constant dense<0.000000e+00> : vector<24xf32>
    %114 = vector.multi_reduction <add>, %113, %cst_35 [1] : vector<24x32xf32> to vector<24xf32>
    %115 = vector.shape_cast %114 : vector<24xf32> to vector<24x1xf32>
    %cst_36 = arith.constant 3.200000e+01 : f32
    %116 = vector.broadcast %cst_36 : f32 to vector<24x1xf32>
    %117 = arith.divf %115, %116 : vector<24x1xf32>
    %118 = vector.broadcast %117 : vector<24x1xf32> to vector<24x32xf32>
    %119 = arith.subf %113, %118 : vector<24x32xf32>
    %120 = arith.mulf %119, %119 : vector<24x32xf32>
    %cst_37 = arith.constant dense<0.000000e+00> : vector<24xf32>
    %121 = vector.multi_reduction <add>, %120, %cst_37 [1] : vector<24x32xf32> to vector<24xf32>
    %122 = vector.shape_cast %121 : vector<24xf32> to vector<24x1xf32>
    %cst_38 = arith.constant 3.200000e+01 : f32
    %123 = vector.broadcast %cst_38 : f32 to vector<24x1xf32>
    %124 = arith.divf %122, %123 : vector<24x1xf32>
    %125 = vector.broadcast %117 : vector<24x1xf32> to vector<24x32xf32>
    %126 = arith.subf %113, %125 : vector<24x32xf32>
    %cst_39 = arith.constant 9.99999974E-6 : f32
    %127 = vector.broadcast %cst_39 : f32 to vector<24x1xf32>
    %128 = arith.addf %124, %127 : vector<24x1xf32>
    %129 = math.rsqrt %128 : vector<24x1xf32>
    %130 = vector.broadcast %129 : vector<24x1xf32> to vector<24x32xf32>
    %131 = arith.mulf %126, %130 : vector<24x32xf32>
    %132 = vector.broadcast %10 : vector<1x32xf32> to vector<24x32xf32>
    %133 = arith.mulf %131, %132 : vector<24x32xf32>
    %134 = vector.broadcast %11 : vector<1x32xf32> to vector<24x32xf32>
    %135 = arith.addf %133, %134 : vector<24x32xf32>
    %136 = arith.truncf %135 : vector<24x32xf32> to vector<24x32xbf16>
    %c0_40 = arith.constant 0 : index
    %c0_41 = arith.constant 0 : index
    %c0_42 = arith.constant 0 : index
    %137 = vector.load %arg7[%c0_40, %c0_41, %c0_42] : memref<2x32x64xbf16, #tpu.memory_space<vmem>>, vector<1x32x64xbf16>
    %138 = vector.shape_cast %137 : vector<1x32x64xbf16> to vector<32x64xbf16>
    %cst_43 = arith.constant dense<0.000000e+00> : vector<24x64xf32>
    %139 = tpu.matmul %136, %138, %cst_43 {dimension_numbers = #tpu.dot_dimension_numbers<[1], [0], [0], [1], [0, 0, 1, 1], [], []>} : vector<24x32xbf16>, vector<32x64xbf16>, vector<24x64xf32> -> vector<24x64xf32>
    %c0_44 = arith.constant 0 : index
    %c0_45 = arith.constant 0 : index
    %c0_46 = arith.constant 0 : index
    %140 = vector.load %arg8[%c0_44, %c0_45, %c0_46] : memref<2x1x64xf32, #tpu.memory_space<vmem>>, vector<1x1x64xf32>
    %141 = vector.shape_cast %140 : vector<1x1x64xf32> to vector<1x64xf32>
    %142 = vector.broadcast %141 : vector<1x64xf32> to vector<24x64xf32>
    %143 = arith.addf %139, %142 : vector<24x64xf32>
    %cst_47 = arith.constant 0.000000e+00 : f32
    %144 = vector.broadcast %cst_47 : f32 to vector<24x64xf32>
    %145 = arith.maximumf %143, %144 : vector<24x64xf32>
    %146 = arith.truncf %145 : vector<24x64xf32> to vector<24x64xbf16>
    %c0_48 = arith.constant 0 : index
    %c0_49 = arith.constant 0 : index
    %c0_50 = arith.constant 0 : index
    %147 = vector.load %arg9[%c0_48, %c0_49, %c0_50] : memref<2x64x32xbf16, #tpu.memory_space<vmem>>, vector<1x64x32xbf16>
    %148 = vector.shape_cast %147 : vector<1x64x32xbf16> to vector<64x32xbf16>
    %cst_51 = arith.constant dense<0.000000e+00> : vector<24x32xf32>
    %149 = tpu.matmul %146, %148, %cst_51 {dimension_numbers = #tpu.dot_dimension_numbers<[1], [0], [0], [1], [0, 0, 1, 1], [], []>} : vector<24x64xbf16>, vector<64x32xbf16>, vector<24x32xf32> -> vector<24x32xf32>
    %150 = vector.broadcast %9 : vector<1x32xf32> to vector<24x32xf32>
    %151 = arith.addf %149, %150 : vector<24x32xf32>
    %152 = arith.addf %135, %151 : vector<24x32xf32>
    %cst_52 = arith.constant dense<0.000000e+00> : vector<24xf32>
    %153 = vector.multi_reduction <add>, %152, %cst_52 [1] : vector<24x32xf32> to vector<24xf32>
    %154 = vector.shape_cast %153 : vector<24xf32> to vector<24x1xf32>
    %cst_53 = arith.constant 3.200000e+01 : f32
    %155 = vector.broadcast %cst_53 : f32 to vector<24x1xf32>
    %156 = arith.divf %154, %155 : vector<24x1xf32>
    %157 = vector.broadcast %156 : vector<24x1xf32> to vector<24x32xf32>
    %158 = arith.subf %152, %157 : vector<24x32xf32>
    %159 = arith.mulf %158, %158 : vector<24x32xf32>
    %cst_54 = arith.constant dense<0.000000e+00> : vector<24xf32>
    %160 = vector.multi_reduction <add>, %159, %cst_54 [1] : vector<24x32xf32> to vector<24xf32>
    %161 = vector.shape_cast %160 : vector<24xf32> to vector<24x1xf32>
    %cst_55 = arith.constant 3.200000e+01 : f32
    %162 = vector.broadcast %cst_55 : f32 to vector<24x1xf32>
    %163 = arith.divf %161, %162 : vector<24x1xf32>
    %164 = vector.broadcast %156 : vector<24x1xf32> to vector<24x32xf32>
    %165 = arith.subf %152, %164 : vector<24x32xf32>
    %cst_56 = arith.constant 9.99999974E-6 : f32
    %166 = vector.broadcast %cst_56 : f32 to vector<24x1xf32>
    %167 = arith.addf %163, %166 : vector<24x1xf32>
    %168 = math.rsqrt %167 : vector<24x1xf32>
    %169 = vector.broadcast %168 : vector<24x1xf32> to vector<24x32xf32>
    %170 = arith.mulf %165, %169 : vector<24x32xf32>
    %171 = vector.broadcast %12 : vector<1x32xf32> to vector<24x32xf32>
    %172 = arith.mulf %170, %171 : vector<24x32xf32>
    %173 = vector.broadcast %13 : vector<1x32xf32> to vector<24x32xf32>
    %174 = arith.addf %172, %173 : vector<24x32xf32>
    %c1 = arith.constant 1 : index
    %c0_57 = arith.constant 0 : index
    %c0_58 = arith.constant 0 : index
    %175 = vector.load %arg10[%c1, %c0_57, %c0_58] : memref<2x6x32xf32, #tpu.memory_space<vmem>>, vector<1x6x32xf32>
    %176 = vector.shape_cast %175 : vector<1x6x32xf32> to vector<6x32xf32>
    %177 = vector.extract_strided_slice %176 {offsets = [0, 0], sizes = [1, 32], strides = [1, 1]} : vector<6x32xf32> to vector<1x32xf32>
    %178 = vector.extract_strided_slice %176 {offsets = [1, 0], sizes = [1, 32], strides = [1, 1]} : vector<6x32xf32> to vector<1x32xf32>
    %179 = vector.extract_strided_slice %176 {offsets = [2, 0], sizes = [1, 32], strides = [1, 1]} : vector<6x32xf32> to vector<1x32xf32>
    %180 = vector.extract_strided_slice %176 {offsets = [3, 0], sizes = [1, 32], strides = [1, 1]} : vector<6x32xf32> to vector<1x32xf32>
    %181 = vector.extract_strided_slice %176 {offsets = [4, 0], sizes = [1, 32], strides = [1, 1]} : vector<6x32xf32> to vector<1x32xf32>
    %182 = vector.extract_strided_slice %176 {offsets = [5, 0], sizes = [1, 32], strides = [1, 1]} : vector<6x32xf32> to vector<1x32xf32>
    %183 = arith.truncf %174 : vector<24x32xf32> to vector<24x32xbf16>
    %c1_59 = arith.constant 1 : index
    %c0_60 = arith.constant 0 : index
    %c0_61 = arith.constant 0 : index
    %184 = vector.load %arg4[%c1_59, %c0_60, %c0_61] : memref<2x32x96xbf16, #tpu.memory_space<vmem>>, vector<1x32x96xbf16>
    %185 = vector.shape_cast %184 : vector<1x32x96xbf16> to vector<32x96xbf16>
    %cst_62 = arith.constant dense<0.000000e+00> : vector<24x96xf32>
    %186 = tpu.matmul %183, %185, %cst_62 {dimension_numbers = #tpu.dot_dimension_numbers<[1], [0], [0], [1], [0, 0, 1, 1], [], []>} : vector<24x32xbf16>, vector<32x96xbf16>, vector<24x96xf32> -> vector<24x96xf32>
    %c1_63 = arith.constant 1 : index
    %c0_64 = arith.constant 0 : index
    %c0_65 = arith.constant 0 : index
    %187 = vector.load %arg5[%c1_63, %c0_64, %c0_65] : memref<2x1x96xf32, #tpu.memory_space<vmem>>, vector<1x1x96xf32>
    %188 = vector.shape_cast %187 : vector<1x1x96xf32> to vector<1x96xf32>
    %189 = vector.broadcast %188 : vector<1x96xf32> to vector<24x96xf32>
    %190 = arith.addf %186, %189 : vector<24x96xf32>
    %191 = vector.extract_strided_slice %190 {offsets = [0, 0], sizes = [12, 32], strides = [1, 1]} : vector<24x96xf32> to vector<12x32xf32>
    %192 = vector.extract_strided_slice %190 {offsets = [0, 32], sizes = [12, 32], strides = [1, 1]} : vector<24x96xf32> to vector<12x32xf32>
    %193 = vector.extract_strided_slice %190 {offsets = [0, 64], sizes = [12, 32], strides = [1, 1]} : vector<24x96xf32> to vector<12x32xf32>
    %194 = vector.extract_strided_slice %191 {offsets = [0, 0], sizes = [12, 16], strides = [1, 1]} : vector<12x32xf32> to vector<12x16xf32>
    %195 = vector.extract_strided_slice %192 {offsets = [0, 0], sizes = [12, 16], strides = [1, 1]} : vector<12x32xf32> to vector<12x16xf32>
    %196 = vector.extract_strided_slice %193 {offsets = [0, 0], sizes = [12, 16], strides = [1, 1]} : vector<12x32xf32> to vector<12x16xf32>
    %197 = arith.truncf %194 : vector<12x16xf32> to vector<12x16xbf16>
    %198 = arith.truncf %195 : vector<12x16xf32> to vector<12x16xbf16>
    %cst_66 = arith.constant dense<0.000000e+00> : vector<12x12xf32>
    %199 = tpu.matmul %197, %198, %cst_66 {dimension_numbers = #tpu.dot_dimension_numbers<[1], [1], [0], [0], [0, 0, 1, 0], [], []>} : vector<12x16xbf16>, vector<12x16xbf16>, vector<12x12xf32> -> vector<12x12xf32>
    %cst_67 = arith.constant dense<0xFF800000> : vector<12xf32>
    %200 = vector.multi_reduction <maximumf>, %199, %cst_67 [1] : vector<12x12xf32> to vector<12xf32>
    %201 = vector.shape_cast %200 : vector<12xf32> to vector<12x1xf32>
    %202 = vector.broadcast %201 : vector<12x1xf32> to vector<12x12xf32>
    %203 = arith.subf %199, %202 : vector<12x12xf32>
    %204 = math.exp %203 : vector<12x12xf32>
    %cst_68 = arith.constant dense<0.000000e+00> : vector<12xf32>
    %205 = vector.multi_reduction <add>, %204, %cst_68 [1] : vector<12x12xf32> to vector<12xf32>
    %206 = vector.shape_cast %205 : vector<12xf32> to vector<12x1xf32>
    %207 = tpu.reciprocal %206 {approx = true} : vector<12x1xf32> -> vector<12x1xf32>
    %208 = vector.broadcast %207 : vector<12x1xf32> to vector<12x12xf32>
    %209 = arith.mulf %204, %208 : vector<12x12xf32>
    %210 = arith.truncf %209 : vector<12x12xf32> to vector<12x12xbf16>
    %211 = arith.truncf %196 : vector<12x16xf32> to vector<12x16xbf16>
    %cst_69 = arith.constant dense<0.000000e+00> : vector<12x16xf32>
    %212 = tpu.matmul %210, %211, %cst_69 {dimension_numbers = #tpu.dot_dimension_numbers<[1], [0], [0], [1], [0, 0, 1, 1], [], []>} : vector<12x12xbf16>, vector<12x16xbf16>, vector<12x16xf32> -> vector<12x16xf32>
    %213 = vector.extract_strided_slice %191 {offsets = [0, 16], sizes = [12, 16], strides = [1, 1]} : vector<12x32xf32> to vector<12x16xf32>
    %214 = vector.extract_strided_slice %192 {offsets = [0, 16], sizes = [12, 16], strides = [1, 1]} : vector<12x32xf32> to vector<12x16xf32>
    %215 = vector.extract_strided_slice %193 {offsets = [0, 16], sizes = [12, 16], strides = [1, 1]} : vector<12x32xf32> to vector<12x16xf32>
    %216 = arith.truncf %213 : vector<12x16xf32> to vector<12x16xbf16>
    %217 = arith.truncf %214 : vector<12x16xf32> to vector<12x16xbf16>
    %cst_70 = arith.constant dense<0.000000e+00> : vector<12x12xf32>
    %218 = tpu.matmul %216, %217, %cst_70 {dimension_numbers = #tpu.dot_dimension_numbers<[1], [1], [0], [0], [0, 0, 1, 0], [], []>} : vector<12x16xbf16>, vector<12x16xbf16>, vector<12x12xf32> -> vector<12x12xf32>
    %cst_71 = arith.constant dense<0xFF800000> : vector<12xf32>
    %219 = vector.multi_reduction <maximumf>, %218, %cst_71 [1] : vector<12x12xf32> to vector<12xf32>
    %220 = vector.shape_cast %219 : vector<12xf32> to vector<12x1xf32>
    %221 = vector.broadcast %220 : vector<12x1xf32> to vector<12x12xf32>
    %222 = arith.subf %218, %221 : vector<12x12xf32>
    %223 = math.exp %222 : vector<12x12xf32>
    %cst_72 = arith.constant dense<0.000000e+00> : vector<12xf32>
    %224 = vector.multi_reduction <add>, %223, %cst_72 [1] : vector<12x12xf32> to vector<12xf32>
    %225 = vector.shape_cast %224 : vector<12xf32> to vector<12x1xf32>
    %226 = tpu.reciprocal %225 {approx = true} : vector<12x1xf32> -> vector<12x1xf32>
    %227 = vector.broadcast %226 : vector<12x1xf32> to vector<12x12xf32>
    %228 = arith.mulf %223, %227 : vector<12x12xf32>
    %229 = arith.truncf %228 : vector<12x12xf32> to vector<12x12xbf16>
    %230 = arith.truncf %215 : vector<12x16xf32> to vector<12x16xbf16>
    %cst_73 = arith.constant dense<0.000000e+00> : vector<12x16xf32>
    %231 = tpu.matmul %229, %230, %cst_73 {dimension_numbers = #tpu.dot_dimension_numbers<[1], [0], [0], [1], [0, 0, 1, 1], [], []>} : vector<12x12xbf16>, vector<12x16xbf16>, vector<12x16xf32> -> vector<12x16xf32>
    %232 = tpu.concatenate %212, %231 in 1 : vector<12x16xf32>, vector<12x16xf32> -> vector<12x32xf32>
    %233 = vector.extract_strided_slice %190 {offsets = [12, 0], sizes = [12, 32], strides = [1, 1]} : vector<24x96xf32> to vector<12x32xf32>
    %234 = vector.extract_strided_slice %190 {offsets = [12, 32], sizes = [12, 32], strides = [1, 1]} : vector<24x96xf32> to vector<12x32xf32>
    %235 = vector.extract_strided_slice %190 {offsets = [12, 64], sizes = [12, 32], strides = [1, 1]} : vector<24x96xf32> to vector<12x32xf32>
    %236 = vector.extract_strided_slice %233 {offsets = [0, 0], sizes = [12, 16], strides = [1, 1]} : vector<12x32xf32> to vector<12x16xf32>
    %237 = vector.extract_strided_slice %234 {offsets = [0, 0], sizes = [12, 16], strides = [1, 1]} : vector<12x32xf32> to vector<12x16xf32>
    %238 = vector.extract_strided_slice %235 {offsets = [0, 0], sizes = [12, 16], strides = [1, 1]} : vector<12x32xf32> to vector<12x16xf32>
    %239 = arith.truncf %236 : vector<12x16xf32> to vector<12x16xbf16>
    %240 = arith.truncf %237 : vector<12x16xf32> to vector<12x16xbf16>
    %cst_74 = arith.constant dense<0.000000e+00> : vector<12x12xf32>
    %241 = tpu.matmul %239, %240, %cst_74 {dimension_numbers = #tpu.dot_dimension_numbers<[1], [1], [0], [0], [0, 0, 1, 0], [], []>} : vector<12x16xbf16>, vector<12x16xbf16>, vector<12x12xf32> -> vector<12x12xf32>
    %cst_75 = arith.constant dense<0xFF800000> : vector<12xf32>
    %242 = vector.multi_reduction <maximumf>, %241, %cst_75 [1] : vector<12x12xf32> to vector<12xf32>
    %243 = vector.shape_cast %242 : vector<12xf32> to vector<12x1xf32>
    %244 = vector.broadcast %243 : vector<12x1xf32> to vector<12x12xf32>
    %245 = arith.subf %241, %244 : vector<12x12xf32>
    %246 = math.exp %245 : vector<12x12xf32>
    %cst_76 = arith.constant dense<0.000000e+00> : vector<12xf32>
    %247 = vector.multi_reduction <add>, %246, %cst_76 [1] : vector<12x12xf32> to vector<12xf32>
    %248 = vector.shape_cast %247 : vector<12xf32> to vector<12x1xf32>
    %249 = tpu.reciprocal %248 {approx = true} : vector<12x1xf32> -> vector<12x1xf32>
    %250 = vector.broadcast %249 : vector<12x1xf32> to vector<12x12xf32>
    %251 = arith.mulf %246, %250 : vector<12x12xf32>
    %252 = arith.truncf %251 : vector<12x12xf32> to vector<12x12xbf16>
    %253 = arith.truncf %238 : vector<12x16xf32> to vector<12x16xbf16>
    %cst_77 = arith.constant dense<0.000000e+00> : vector<12x16xf32>
    %254 = tpu.matmul %252, %253, %cst_77 {dimension_numbers = #tpu.dot_dimension_numbers<[1], [0], [0], [1], [0, 0, 1, 1], [], []>} : vector<12x12xbf16>, vector<12x16xbf16>, vector<12x16xf32> -> vector<12x16xf32>
    %255 = vector.extract_strided_slice %233 {offsets = [0, 16], sizes = [12, 16], strides = [1, 1]} : vector<12x32xf32> to vector<12x16xf32>
    %256 = vector.extract_strided_slice %234 {offsets = [0, 16], sizes = [12, 16], strides = [1, 1]} : vector<12x32xf32> to vector<12x16xf32>
    %257 = vector.extract_strided_slice %235 {offsets = [0, 16], sizes = [12, 16], strides = [1, 1]} : vector<12x32xf32> to vector<12x16xf32>
    %258 = arith.truncf %255 : vector<12x16xf32> to vector<12x16xbf16>
    %259 = arith.truncf %256 : vector<12x16xf32> to vector<12x16xbf16>
    %cst_78 = arith.constant dense<0.000000e+00> : vector<12x12xf32>
    %260 = tpu.matmul %258, %259, %cst_78 {dimension_numbers = #tpu.dot_dimension_numbers<[1], [1], [0], [0], [0, 0, 1, 0], [], []>} : vector<12x16xbf16>, vector<12x16xbf16>, vector<12x12xf32> -> vector<12x12xf32>
    %cst_79 = arith.constant dense<0xFF800000> : vector<12xf32>
    %261 = vector.multi_reduction <maximumf>, %260, %cst_79 [1] : vector<12x12xf32> to vector<12xf32>
    %262 = vector.shape_cast %261 : vector<12xf32> to vector<12x1xf32>
    %263 = vector.broadcast %262 : vector<12x1xf32> to vector<12x12xf32>
    %264 = arith.subf %260, %263 : vector<12x12xf32>
    %265 = math.exp %264 : vector<12x12xf32>
    %cst_80 = arith.constant dense<0.000000e+00> : vector<12xf32>
    %266 = vector.multi_reduction <add>, %265, %cst_80 [1] : vector<12x12xf32> to vector<12xf32>
    %267 = vector.shape_cast %266 : vector<12xf32> to vector<12x1xf32>
    %268 = tpu.reciprocal %267 {approx = true} : vector<12x1xf32> -> vector<12x1xf32>
    %269 = vector.broadcast %268 : vector<12x1xf32> to vector<12x12xf32>
    %270 = arith.mulf %265, %269 : vector<12x12xf32>
    %271 = arith.truncf %270 : vector<12x12xf32> to vector<12x12xbf16>
    %272 = arith.truncf %257 : vector<12x16xf32> to vector<12x16xbf16>
    %cst_81 = arith.constant dense<0.000000e+00> : vector<12x16xf32>
    %273 = tpu.matmul %271, %272, %cst_81 {dimension_numbers = #tpu.dot_dimension_numbers<[1], [0], [0], [1], [0, 0, 1, 1], [], []>} : vector<12x12xbf16>, vector<12x16xbf16>, vector<12x16xf32> -> vector<12x16xf32>
    %274 = tpu.concatenate %254, %273 in 1 : vector<12x16xf32>, vector<12x16xf32> -> vector<12x32xf32>
    %275 = tpu.concatenate %232, %274 in 0 : vector<12x32xf32>, vector<12x32xf32> -> vector<24x32xf32>
    %276 = arith.truncf %275 : vector<24x32xf32> to vector<24x32xbf16>
    %c1_82 = arith.constant 1 : index
    %c0_83 = arith.constant 0 : index
    %c0_84 = arith.constant 0 : index
    %277 = vector.load %arg6[%c1_82, %c0_83, %c0_84] : memref<2x32x32xbf16, #tpu.memory_space<vmem>>, vector<1x32x32xbf16>
    %278 = vector.shape_cast %277 : vector<1x32x32xbf16> to vector<32x32xbf16>
    %cst_85 = arith.constant dense<0.000000e+00> : vector<24x32xf32>
    %279 = tpu.matmul %276, %278, %cst_85 {dimension_numbers = #tpu.dot_dimension_numbers<[1], [0], [0], [1], [0, 0, 1, 1], [], []>} : vector<24x32xbf16>, vector<32x32xbf16>, vector<24x32xf32> -> vector<24x32xf32>
    %280 = vector.broadcast %177 : vector<1x32xf32> to vector<24x32xf32>
    %281 = arith.addf %279, %280 : vector<24x32xf32>
    %282 = arith.addf %174, %281 : vector<24x32xf32>
    %cst_86 = arith.constant dense<0.000000e+00> : vector<24xf32>
    %283 = vector.multi_reduction <add>, %282, %cst_86 [1] : vector<24x32xf32> to vector<24xf32>
    %284 = vector.shape_cast %283 : vector<24xf32> to vector<24x1xf32>
    %cst_87 = arith.constant 3.200000e+01 : f32
    %285 = vector.broadcast %cst_87 : f32 to vector<24x1xf32>
    %286 = arith.divf %284, %285 : vector<24x1xf32>
    %287 = vector.broadcast %286 : vector<24x1xf32> to vector<24x32xf32>
    %288 = arith.subf %282, %287 : vector<24x32xf32>
    %289 = arith.mulf %288, %288 : vector<24x32xf32>
    %cst_88 = arith.constant dense<0.000000e+00> : vector<24xf32>
    %290 = vector.multi_reduction <add>, %289, %cst_88 [1] : vector<24x32xf32> to vector<24xf32>
    %291 = vector.shape_cast %290 : vector<24xf32> to vector<24x1xf32>
    %cst_89 = arith.constant 3.200000e+01 : f32
    %292 = vector.broadcast %cst_89 : f32 to vector<24x1xf32>
    %293 = arith.divf %291, %292 : vector<24x1xf32>
    %294 = vector.broadcast %286 : vector<24x1xf32> to vector<24x32xf32>
    %295 = arith.subf %282, %294 : vector<24x32xf32>
    %cst_90 = arith.constant 9.99999974E-6 : f32
    %296 = vector.broadcast %cst_90 : f32 to vector<24x1xf32>
    %297 = arith.addf %293, %296 : vector<24x1xf32>
    %298 = math.rsqrt %297 : vector<24x1xf32>
    %299 = vector.broadcast %298 : vector<24x1xf32> to vector<24x32xf32>
    %300 = arith.mulf %295, %299 : vector<24x32xf32>
    %301 = vector.broadcast %179 : vector<1x32xf32> to vector<24x32xf32>
    %302 = arith.mulf %300, %301 : vector<24x32xf32>
    %303 = vector.broadcast %180 : vector<1x32xf32> to vector<24x32xf32>
    %304 = arith.addf %302, %303 : vector<24x32xf32>
    %305 = arith.truncf %304 : vector<24x32xf32> to vector<24x32xbf16>
    %c1_91 = arith.constant 1 : index
    %c0_92 = arith.constant 0 : index
    %c0_93 = arith.constant 0 : index
    %306 = vector.load %arg7[%c1_91, %c0_92, %c0_93] : memref<2x32x64xbf16, #tpu.memory_space<vmem>>, vector<1x32x64xbf16>
    %307 = vector.shape_cast %306 : vector<1x32x64xbf16> to vector<32x64xbf16>
    %cst_94 = arith.constant dense<0.000000e+00> : vector<24x64xf32>
    %308 = tpu.matmul %305, %307, %cst_94 {dimension_numbers = #tpu.dot_dimension_numbers<[1], [0], [0], [1], [0, 0, 1, 1], [], []>} : vector<24x32xbf16>, vector<32x64xbf16>, vector<24x64xf32> -> vector<24x64xf32>
    %c1_95 = arith.constant 1 : index
    %c0_96 = arith.constant 0 : index
    %c0_97 = arith.constant 0 : index
    %309 = vector.load %arg8[%c1_95, %c0_96, %c0_97] : memref<2x1x64xf32, #tpu.memory_space<vmem>>, vector<1x1x64xf32>
    %310 = vector.shape_cast %309 : vector<1x1x64xf32> to vector<1x64xf32>
    %311 = vector.broadcast %310 : vector<1x64xf32> to vector<24x64xf32>
    %312 = arith.addf %308, %311 : vector<24x64xf32>
    %cst_98 = arith.constant 0.000000e+00 : f32
    %313 = vector.broadcast %cst_98 : f32 to vector<24x64xf32>
    %314 = arith.maximumf %312, %313 : vector<24x64xf32>
    %315 = arith.truncf %314 : vector<24x64xf32> to vector<24x64xbf16>
    %c1_99 = arith.constant 1 : index
    %c0_100 = arith.constant 0 : index
    %c0_101 = arith.constant 0 : index
    %316 = vector.load %arg9[%c1_99, %c0_100, %c0_101] : memref<2x64x32xbf16, #tpu.memory_space<vmem>>, vector<1x64x32xbf16>
    %317 = vector.shape_cast %316 : vector<1x64x32xbf16> to vector<64x32xbf16>
    %cst_102 = arith.constant dense<0.000000e+00> : vector<24x32xf32>
    %318 = tpu.matmul %315, %317, %cst_102 {dimension_numbers = #tpu.dot_dimension_numbers<[1], [0], [0], [1], [0, 0, 1, 1], [], []>} : vector<24x64xbf16>, vector<64x32xbf16>, vector<24x32xf32> -> vector<24x32xf32>
    %319 = vector.broadcast %178 : vector<1x32xf32> to vector<24x32xf32>
    %320 = arith.addf %318, %319 : vector<24x32xf32>
    %321 = arith.addf %304, %320 : vector<24x32xf32>
    %cst_103 = arith.constant dense<0.000000e+00> : vector<24xf32>
    %322 = vector.multi_reduction <add>, %321, %cst_103 [1] : vector<24x32xf32> to vector<24xf32>
    %323 = vector.shape_cast %322 : vector<24xf32> to vector<24x1xf32>
    %cst_104 = arith.constant 3.200000e+01 : f32
    %324 = vector.broadcast %cst_104 : f32 to vector<24x1xf32>
    %325 = arith.divf %323, %324 : vector<24x1xf32>
    %326 = vector.broadcast %325 : vector<24x1xf32> to vector<24x32xf32>
    %327 = arith.subf %321, %326 : vector<24x32xf32>
    %328 = arith.mulf %327, %327 : vector<24x32xf32>
    %cst_105 = arith.constant dense<0.000000e+00> : vector<24xf32>
    %329 = vector.multi_reduction <add>, %328, %cst_105 [1] : vector<24x32xf32> to vector<24xf32>
    %330 = vector.shape_cast %329 : vector<24xf32> to vector<24x1xf32>
    %cst_106 = arith.constant 3.200000e+01 : f32
    %331 = vector.broadcast %cst_106 : f32 to vector<24x1xf32>
    %332 = arith.divf %330, %331 : vector<24x1xf32>
    %333 = vector.broadcast %325 : vector<24x1xf32> to vector<24x32xf32>
    %334 = arith.subf %321, %333 : vector<24x32xf32>
    %cst_107 = arith.constant 9.99999974E-6 : f32
    %335 = vector.broadcast %cst_107 : f32 to vector<24x1xf32>
    %336 = arith.addf %332, %335 : vector<24x1xf32>
    %337 = math.rsqrt %336 : vector<24x1xf32>
    %338 = vector.broadcast %337 : vector<24x1xf32> to vector<24x32xf32>
    %339 = arith.mulf %334, %338 : vector<24x32xf32>
    %340 = vector.broadcast %181 : vector<1x32xf32> to vector<24x32xf32>
    %341 = arith.mulf %339, %340 : vector<24x32xf32>
    %342 = vector.broadcast %182 : vector<1x32xf32> to vector<24x32xf32>
    %343 = arith.addf %341, %342 : vector<24x32xf32>
    %344 = arith.truncf %343 : vector<24x32xf32> to vector<24x32xbf16>
    %c0_108 = arith.constant 0 : index
    %c0_109 = arith.constant 0 : index
    %345 = vector.load %arg11[%c0_108, %c0_109] : memref<32x128xbf16, #tpu.memory_space<vmem>>, vector<32x128xbf16>
    %cst_110 = arith.constant dense<0.000000e+00> : vector<24x128xf32>
    %346 = tpu.matmul %344, %345, %cst_110 {dimension_numbers = #tpu.dot_dimension_numbers<[1], [0], [0], [1], [0, 0, 1, 1], [], []>} : vector<24x32xbf16>, vector<32x128xbf16>, vector<24x128xf32> -> vector<24x128xf32>
    %c0_111 = arith.constant 0 : index
    %c0_112 = arith.constant 0 : index
    %347 = vector.load %arg12[%c0_111, %c0_112] : memref<1x128xf32, #tpu.memory_space<vmem>>, vector<1x128xf32>
    %348 = vector.broadcast %347 : vector<1x128xf32> to vector<24x128xf32>
    %349 = arith.addf %346, %348 : vector<24x128xf32>
    %c0_113 = arith.constant 0 : index
    %c0_114 = arith.constant 0 : index
    %350 = vector.load %arg13[%c0_113, %c0_114] : memref<24x128xf32, #tpu.memory_space<vmem>>, vector<24x128xf32>
    tpu.vector_store %arg13[%c0_113, %c0_114], %349 {strides = array<i32>} : memref<24x128xf32, #tpu.memory_space<vmem>>, vector<24x128xf32>,
    return
  }
  func.func @transform_0(%arg0: i32) -> (i32, i32) {
    %c0_i32 = arith.constant 0 : i32
    %c0_i32_0 = arith.constant 0 : i32
    %c0_i32_1 = arith.constant 0 : i32
    return %c0_i32, %c0_i32_0 : i32, i32
  }
  func.func @transform_1(%arg0: i32) -> (i32, i32) {
    %c0_i32 = arith.constant 0 : i32
    %c0_i32_0 = arith.constant 0 : i32
    %c0_i32_1 = arith.constant 0 : i32
    return %c0_i32, %c0_i32_0 : i32, i32
  }
  func.func @transform_2(%arg0: i32) -> (i32, i32) {
    %c0_i32 = arith.constant 0 : i32
    %c0_i32_0 = arith.constant 0 : i32
    %c0_i32_1 = arith.constant 0 : i32
    return %c0_i32, %c0_i32_0 : i32, i32
  }
  func.func @transform_3(%arg0: i32) -> (i32, i32, i32) {
    %c0_i32 = arith.constant 0 : i32
    %c0_i32_0 = arith.constant 0 : i32
    %c0_i32_1 = arith.constant 0 : i32
    %c0_i32_2 = arith.constant 0 : i32
    return %c0_i32, %c0_i32_0, %c0_i32_1 : i32, i32, i32
  }
  func.func @transform_4(%arg0: i32) -> (i32, i32, i32) {
    %c0_i32 = arith.constant 0 : i32
    %c0_i32_0 = arith.constant 0 : i32
    %c0_i32_1 = arith.constant 0 : i32
    %c0_i32_2 = arith.constant 0 : i32
    return %c0_i32, %c0_i32_0, %c0_i32_1 : i32, i32, i32
  }
  func.func @transform_5(%arg0: i32) -> (i32, i32, i32) {
    %c0_i32 = arith.constant 0 : i32
    %c0_i32_0 = arith.constant 0 : i32
    %c0_i32_1 = arith.constant 0 : i32
    %c0_i32_2 = arith.constant 0 : i32
    return %c0_i32, %c0_i32_0, %c0_i32_1 : i32, i32, i32
  }
  func.func @transform_6(%arg0: i32) -> (i32, i32, i32) {
    %c0_i32 = arith.constant 0 : i32
    %c0_i32_0 = arith.constant 0 : i32
    %c0_i32_1 = arith.constant 0 : i32
    %c0_i32_2 = arith.constant 0 : i32
    return %c0_i32, %c0_i32_0, %c0_i32_1 : i32, i32, i32
  }
  func.func @transform_7(%arg0: i32) -> (i32, i32, i32) {
    %c0_i32 = arith.constant 0 : i32
    %c0_i32_0 = arith.constant 0 : i32
    %c0_i32_1 = arith.constant 0 : i32
    %c0_i32_2 = arith.constant 0 : i32
    return %c0_i32, %c0_i32_0, %c0_i32_1 : i32, i32, i32
  }
  func.func @transform_8(%arg0: i32) -> (i32, i32, i32) {
    %c0_i32 = arith.constant 0 : i32
    %c0_i32_0 = arith.constant 0 : i32
    %c0_i32_1 = arith.constant 0 : i32
    %c0_i32_2 = arith.constant 0 : i32
    return %c0_i32, %c0_i32_0, %c0_i32_1 : i32, i32, i32
  }
  func.func @transform_9(%arg0: i32) -> (i32, i32, i32) {
    %c0_i32 = arith.constant 0 : i32
    %c0_i32_0 = arith.constant 0 : i32
    %c0_i32_1 = arith.constant 0 : i32
    %c0_i32_2 = arith.constant 0 : i32
    return %c0_i32, %c0_i32_0, %c0_i32_1 : i32, i32, i32
  }
  func.func @transform_10(%arg0: i32) -> (i32, i32) {
    %c0_i32 = arith.constant 0 : i32
    %c0_i32_0 = arith.constant 0 : i32
    %c0_i32_1 = arith.constant 0 : i32
    return %c0_i32, %c0_i32_0 : i32, i32
  }
  func.func @transform_11(%arg0: i32) -> (i32, i32) {
    %c0_i32 = arith.constant 0 : i32
    %c0_i32_0 = arith.constant 0 : i32
    %c0_i32_1 = arith.constant 0 : i32
    return %c0_i32, %c0_i32_0 : i32, i32
  }
  func.func @transform_12(%arg0: i32) -> (i32, i32) {
    %c0_i32 = arith.constant 0 : i32
    %c0_i32_0 = arith.constant 0 : i32
    %c0_i32_1 = arith.constant 0 : i32
    return %c0_i32, %c0_i32_0 : i32, i32
  }
}

</mosaic_0001>

<bundles_post_ra>
// kernel: tpu_custom_call.1
= control target key start
LH: loop header
LB: loop body
LE: loop exit
PB: predicated region body
PF: predicated region fallthrough
CT: control target
= control target key end

     0   :  { %17 = vsyncpa [#allocation3], 0  ;;  %s2283_s0 = inlined_call_operand.vmem [shape: f32[24,8], index: 0, kind: input, shape index: {}]   ;;  %s2284_s1 = inlined_call_operand.vmem [shape: f32[24,32], index: 1, kind: input, shape index: {}]   ;;  %s2285_s2 = inlined_call_operand.vmem [shape: bf16[8,32], index: 2, kind: input, shape index: {}]   ;;  %s2286_s3 = inlined_call_operand.vmem [shape: bf16[2,32,96], index: 3, kind: input, shape index: {}]   ;;  %s2287_s4 = inlined_call_operand.vmem [shape: f32[2,1,96], index: 4, kind: input, shape index: {}]   ;;  %s2288_s5 = inlined_call_operand.vmem [shape: bf16[2,32,32], index: 5, kind: input, shape index: {}]   ;;  %s2289_s6 = inlined_call_operand.vmem [shape: bf16[2,32,64], index: 6, kind: input, shape index: {}]   ;;  %s2290_s7 = inlined_call_operand.vmem [shape: f32[2,1,64], index: 7, kind: input, shape index: {}]   ;;  %s2291_s8 = inlined_call_operand.vmem [shape: bf16[2,64,32], index: 8, kind: input, shape index: {}]   ;;  %s2292_s9 = inlined_call_operand.vmem [shape: f32[2,6,32], index: 9, kind: input, shape index: {}]   ;;  %s2293_s10 = inlined_call_operand.hbm [shape: bf16[32,128], index: 10, kind: input, shape index: {}]   ;;  %s2294_s11 = inlined_call_operand.vmem [shape: f32[1,128], index: 11, kind: input, shape index: {}]   ;;  %s2295_s12 = inlined_call_operand.hbm [shape: f32[24,128], index: 12, kind: output, shape index: {}]  }
   0x1   :  { %18 = vsyncpa [#allocation4], 0  ;;  %s43_s23 = sshll.u32 %s2293_s10, 4  ;;  %s1837_s24 = smov [#allocation2]   ;;  %s44_s23 = int_to_ptr.hbm [resolvable:$true] %s43_s23 }
   0x2   :  { %s45_s25 = sshll.u32 %s1837_s24, 4  ;;  %s1838_s26 = smov 64   ;;  %s46_s25 = int_to_ptr.vmem [resolvable:$true] %s45_s25 }
   0x3   :  { %s1839_s27 = smov 4  }
   0x4   :  { %51 = dma.hbm_to_vmem [thread:$0]  %s44_s23, 256, %s46_s25, [#allocation3], %s1838_s26, %s1838_s26, %s1839_s27  }
   0x5   :  { %1833 = dma.done.wait [#allocation3], 256  }
   0x6   :  { %1834 = vsyncadd [#allocation3], 4294967040  ;;  %vm75_vm0 = vcmask 1043456   ;;  %v64_v0 = vld [vmem:[%s2285_s2] sm:$0xf]  ;;  %v60_v2 = vld [vmem:[%s2283_s0 + $0x8] sm:$0xff] }
   0x7   :  { %v59_v1 = vld [vmem:[%s2283_s0] sm:$0xff]  ;;  %v77_v3 = vsel %vm75_vm0, %v64_v0, 0  ;;  %vm68_vm1 = vcmask 64512   ;;  %v61_v5 = vld [vmem:[%s2283_s0 + $0x10] sm:$0xff]  ;;  %v1647_v7 = vld [vmem:[%s2286_s3 + $0x8] sm:$0xff]  ;;  %vm120_vm2 = vcmask 261120  }
   0x8   :  { %v62_v4 = vpack.c.bf16 %v60_v2, %v59_v1  ;;  %86 = vmatpush.bf16.msra.mxu0 %v77_v3  ;;  %v63_v6 = vpack.c.bf16 %v61_v5, %v61_v5  ;;  %133 = vmatpush.bf16.msra.mxu1 %v1647_v7  ;;  %v1646_v8 = vld [vmem:[%s2286_s3] sm:$0xff]  ;;  %v66_v11 = vld [vmem:[%s2284_s1 + $0x8] sm:$0xff]  ;;  %v67_v17 = vld [vmem:[%s2284_s1 + $0x10] sm:$0xff]  ;;  %vm200_vm3 = vcmask 1045504   ;;  %vm149_vm4 = vcmask 130048   ;;  %s1841_s28 = smov 80  }
   0x9   :  { %v65_v10 = vld [vmem:[%s2284_s1] sm:$0xff]  ;;  %s1840_s1 = smov 96   ;;  %vm170_vm5 = vcmask 97280   ;;  %vm174_vm6 = vcmask 93184   ;;  %s1842_s29 = smov 112  }
   0xa   :  { %v1690_v22 = vld [vmem:[%s2287_s4] ss:$0 sm:$0xff]  ;;  %s1843_s30 = smov 48   ;;  %s1844_s13 = smov 16  }
   0xb   :  { %1499 = vmatmul.msk.bf16.vlgmr.msra.gmra.mxu0 %vm68_vm1, %v62_v4  ;;  %s1846_s16 = smov [#allocation5]   ;;  %s1486_s19 = sshll.u32 %s2295_s12, 4  ;;  %s1487_s19 = int_to_ptr.hbm [resolvable:$true] %s1486_s19 }
   0xc   :  { %134 = vmatpush.bf16.msra.mxu1 %v1646_v8  ;;  %s1484_s2 = sshll.u32 %s1846_s16, 4  ;;  %s1848_s20 = smov 8   ;;  %s1485_s2 = int_to_ptr.vmem [resolvable:$true] %s1484_s2 }
  0x1b   :  { %1500 = vmatmul.msk.bf16.gmra.mxu0 %vm68_vm1, %v63_v6 }
  0x88   :  { %v88_v9 = vpop.f32.mrf.mxu0 }
  0x89   :  { %v1944_v13 = vadd.f32 %v88_v9, %v65_v10 }
  0x90   :  { %v90_v12 = vpop.f32.mrf.mxu0 }
  0x91   :  { %v1946_v14 = vadd.f32 %v90_v12, %v66_v11 }
  0x93   :  { %v98_v15 = vpack.c.bf16 %v1946_v14, %v1944_v13 }
  0x95   :  { %1509 = vmatmul.msk.bf16.vlgmr.msra.gmra.mxu1 %vm120_vm2, %v98_v15 }
  0x98   :  { %v93_v16 = vpop.f32.mrf.mxu0 }
  0x99   :  { %v1954_v18 = vadd.f32 %v93_v16, %v67_v17 }
  0x9b   :  { %v99_v20 = vpack.c.bf16 %v1954_v18, %v1954_v18 }
  0xa0   :  { %v95_v19 = vpop.f32.mrf.mxu0 }
  0xa5   :  { %1510 = vmatmul.msk.bf16.gmra.mxu1 %vm120_vm2, %v99_v20 }
 0x112   :  { %v136_v21 = vpop.f32.mrf.mxu1 }
 0x113   :  { %v137_v24 = vadd.f32 %v1690_v22, %v136_v21 }
 0x11a   :  { %v138_v23 = vpop.f32.mrf.mxu1 }
 0x11b   :  { %v139_v25 = vadd.f32 %v1690_v22, %v138_v23 }
 0x11d   :  { %v1962_v26 = vpack.c.bf16 %v139_v25, %v137_v24 }
 0x11f   :  { %195 = vrot.lane.b32.xlu2 %v1962_v26, %s1838_s26  ;;  %147 = vrot.lane.b32.xlu0 %v1962_v26, %s1840_s1 }
 0x122   :  { %v141_v27 = vpop.f32.mrf.mxu1 }
 0x123   :  { %v142_v28 = vadd.f32 %v1690_v22, %v141_v27 }
 0x125   :  { %v297_v29 = vpack.c.bf16 %v142_v28, %v139_v25 }
 0x127   :  { %v1978_v49 = vrot.slane %v297_v29, 2 }
 0x12a   :  { %v143_v30 = vpop.f32.mrf.mxu1 }
 0x179   :  { %v196_v31 = vpop.permute.xlu2 %195 }
 0x17a   :  { %v202_v32 = vsel %vm200_vm3, %v196_v31, 0 }
 0x17b   :  { %211 = vmatpush.bf16.msra.mxu3 %v202_v32 }
 0x191   :  { %v148_v33 = vpop.permute.xlu0 %147 }
 0x192   :  { %v154_v34 = vsel %vm149_vm4, %v148_v33, 0 }
 0x193   :  { %163 = vmatpush.bf16.xpose.msra.mxu2 %v154_v34 }
 0x19a   :  { %1511 = vmatmul.msk.bf16.vlgmr.msra.gmra.mxu2 %vm149_vm4, %v1962_v26 }
 0x21d   :  { %v165_v35 = vpop.f32.mrf.mxu2 }
 0x21e   :  { %v171_v36 = vsel %vm170_vm5, %v165_v35, -inf }
 0x21f   :  { %172 = vmax.xlane.f32.xlu0 %v171_v36 }
 0x225   :  { %v167_v37 = vpop.f32.mrf.mxu2 }
 0x226   :  { %v175_v38 = vsel %vm174_vm6, %v167_v37, -inf }
 0x227   :  { %176 = vmax.xlane.f32.xlu1 %v175_v38 }
 0x292   :  { %v173_v39 = vpop.xlane.xlu0 %172 }
 0x293   :  { %v178_v40 = vsub.f32 %v165_v35, %v173_v39 }
 0x295   :  { %v180_v41 = vmul.f32 1.442695, %v178_v40 }
 0x297   :  { %1695 = vpow2.f32 %v180_v41 }
 0x29a   :  { %v177_v42 = vpop.xlane.xlu1 %176 }
 0x29b   :  { %v179_v43 = vsub.f32 %v167_v37, %v177_v42 }
 0x29d   :  { %v1696_v44 = vpop.eup %1695  ;;  %v182_v45 = vmul.f32 1.442695, %v179_v43 }
 0x29e   :  { %v184_v46 = vsel %vm170_vm5, %v1696_v44, 0.0 }
 0x29f   :  { %1697 = vpow2.f32 %v182_v45  ;;  %185 = vadd.xlane.f32.xlu1 %v184_v46 }
 0x2a5   :  { %v1698_v47 = vpop.eup %1697 }
 0x2a6   :  { %v187_v48 = vsel %vm174_vm6, %v1698_v47, 0.0 }
 0x2a7   :  { %188 = vadd.xlane.f32.xlu2 %v187_v48 }
 0x2b8   :  { %220 = vrot.lane.b32.xlu1 %v1962_v26, %s1841_s28 }
 0x2bf   :  { %218 = vrot.lane.b32.xlu2 %v1962_v26, %s1842_s29 }
 0x2c0   :  { %367 = vrot.lane.b32.xlu1 %v1978_v49, %s1842_s29 }
 0x2c7   :  { %369 = vrot.lane.b32.xlu2 %v1978_v49, %s1841_s28 }
 0x2cf   :  { %300 = vrot.lane.b32.xlu2 %v1978_v49, %s1840_s1 }
 0x312   :  { %v186_v50 = vpop.xlane.xlu1 %185 }
 0x313   :  { %1699 = vrcp.f32 %v186_v50 }
 0x319   :  { %v1700_v52 = vpop.eup %1699 }
 0x31a   :  { %v189_v51 = vpop.xlane.xlu2 %188  ;;  %v192_v55 = vmul.f32 %v1700_v52, %v1696_v44 }
 0x31b   :  { %1701 = vrcp.f32 %v189_v51 }
 0x321   :  { %v1702_v53 = vpop.eup %1701 }
 0x322   :  { %v219_v54 = vpop.permute.xlu2 %218  ;;  %v193_v56 = vmul.f32 %v1702_v53, %v1698_v47 }
 0x324   :  { %v194_v57 = vpack.c.bf16 %v193_v56, %v192_v55 }
 0x326   :  { %1512 = vmatmul.msk.bf16.vlgmr.msra.gmra.mxu3 %vm170_vm5, %v194_v57 }
 0x32a   :  { %v370_v58 = vpop.permute.xlu2 %369  ;;  %v221_v59 = vpop.permute.xlu1 %220 }
 0x32b   :  { %v226_v60 = vsel %vm149_vm4, %v221_v59, 0  ;;  %v375_v61 = vsel %vm149_vm4, %v370_v58, 0 }
 0x32c   :  { %235 = vmatpush.bf16.xpose.msrb.mxu3 %v226_v60  ;;  %384 = vmatpush.bf16.xpose.msrb.mxu1 %v375_v61 }
 0x332   :  { %v301_v62 = vpop.permute.xlu2 %300  ;;  %v368_v63 = vpop.permute.xlu1 %367 }
 0x333   :  { %1517 = vmatmul.msk.bf16.vlgmr.msrb.gmra.mxu1 %vm149_vm4, %v368_v63  ;;  %v306_v0 = vsel %vm149_vm4, %v301_v62, 0 }
 0x334   :  { %315 = vmatpush.bf16.xpose.msrb.mxu0 %v306_v0 }
 0x336   :  { %1513 = vmatmul.msk.bf16.vlgmr.msrb.gmra.mxu3 %vm149_vm4, %v219_v54 }
 0x33b   :  { %1515 = vmatmul.msk.bf16.vlgmr.msrb.gmra.mxu0 %vm149_vm4, %v1978_v49 }
 0x3a9   :  { %v1996_v1 = vpop.f32.mrf.mxu3 }
 0x3b0   :  { %v386_v2 = vpop.f32.mrf.mxu1 }
 0x3b1   :  { %v1998_v3 = vpop.f32.mrf.mxu3  ;;  %v391_v4 = vsel %vm170_vm5, %v386_v2, -inf }
 0x3b2   :  { %392 = vmax.xlane.f32.xlu2 %v391_v4 }
 0x3b8   :  { %v388_v9 = vpop.f32.mrf.mxu1  ;;  %v317_v11 = vpop.f32.mrf.mxu0 }
 0x3b9   :  { %v237_v5 = vpop.f32.mrf.mxu3  ;;  %v394_v10 = vsel %vm174_vm6, %v388_v9, -inf  ;;  %v322_v12 = vsel %vm170_vm5, %v317_v11, -inf }
 0x3ba   :  { %v242_v6 = vsel %vm170_vm5, %v237_v5, -inf }
 0x3bb   :  { %243 = vmax.xlane.f32.xlu1 %v242_v6 }
 0x3c0   :  { %v319_v36 = vpop.f32.mrf.mxu0 }
 0x3c1   :  { %v239_v7 = vpop.f32.mrf.mxu3  ;;  %v325_v39 = vsel %vm174_vm6, %v319_v36, -inf }
 0x3c2   :  { %v245_v8 = vsel %vm174_vm6, %v239_v7, -inf }
 0x3c3   :  { %246 = vmax.xlane.f32.xlu0 %v245_v8 }
 0x3cb   :  { %395 = vmax.xlane.f32.xlu0 %v394_v10 }
 0x3d3   :  { %323 = vmax.xlane.f32.xlu0 %v322_v12 }
 0x3d4   :  { %265 = vrot.lane.b32.xlu1 %v1962_v26, %s1843_s30 }
 0x3dc   :  { %345 = vrot.lane.b32.xlu1 %v1978_v49, %s1838_s26 }
 0x425   :  { %v393_v15 = vpop.xlane.xlu2 %392 }
 0x426   :  { %v397_v16 = vsub.f32 %v386_v2, %v393_v15 }
 0x428   :  { %v399_v17 = vmul.f32 1.442695, %v397_v16 }
 0x42a   :  { %1703 = vpow2.f32 %v399_v17 }
 0x42e   :  { %v244_v19 = vpop.xlane.xlu1 %243 }
 0x42f   :  { %v248_v20 = vsub.f32 %v237_v5, %v244_v19 }
 0x430   :  { %v2009_v21 = vpop.eup %1703 }
 0x431   :  { %v250_v22 = vmul.f32 1.442695, %v248_v20  ;;  %v403_v23 = vsel %vm170_vm5, %v2009_v21, 0.0 }
 0x432   :  { %404 = vadd.xlane.f32.xlu2 %v403_v23 }
 0x433   :  { %1705 = vpow2.f32 %v250_v22  ;;  %v1648_v22 = vld [vmem:[%s2288_s5] sm:$0xff] }
 0x436   :  { %v247_v24 = vpop.xlane.xlu0 %246 }
 0x437   :  { %v249_v25 = vsub.f32 %v239_v7, %v247_v24 }
 0x439   :  { %v1706_v26 = vpop.eup %1705  ;;  %v252_v27 = vmul.f32 1.442695, %v249_v25 }
 0x43a   :  { %v254_v28 = vsel %vm170_vm5, %v1706_v26, 0.0 }
 0x43b   :  { %1707 = vpow2.f32 %v252_v27  ;;  %255 = vadd.xlane.f32.xlu0 %v254_v28 }
 0x43e   :  { %v396_v29 = vpop.xlane.xlu0 %395 }
 0x43f   :  { %v398_v31 = vsub.f32 %v388_v9, %v396_v29 }
 0x441   :  { %v1708_v30 = vpop.eup %1707  ;;  %v401_v33 = vmul.f32 1.442695, %v398_v31 }
 0x442   :  { %v257_v32 = vsel %vm174_vm6, %v1708_v30, 0.0 }
 0x443   :  { %258 = vadd.xlane.f32.xlu0 %v257_v32  ;;  %1709 = vpow2.f32 %v401_v33 }
 0x446   :  { %v324_v34 = vpop.xlane.xlu0 %323  ;;  %v266_v35 = vpop.permute.xlu1 %265 }
 0x447   :  { %v271_v37 = vsel %vm200_vm3, %v266_v35, 0  ;;  %v328_v38 = vsub.f32 %v317_v11, %v324_v34 }
 0x448   :  { %280 = vmatpush.bf16.msrb.mxu2 %v271_v37 }
 0x449   :  { %v330_v40 = vmul.f32 1.442695, %v328_v38  ;;  %v1710_v42 = vpop.eup %1709 }
 0x44a   :  { %414 = vrot.lane.b32.xlu2 %v1978_v49, %s1843_s30  ;;  %v406_v44 = vsel %vm174_vm6, %v1710_v42, 0.0 }
 0x44b   :  { %326 = vmax.xlane.f32.xlu0 %v325_v39  ;;  %1711 = vpow2.f32 %v330_v40 }
 0x44e   :  { %v346_v41 = vpop.permute.xlu1 %345 }
 0x44f   :  { %v351_v43 = vsel %vm200_vm3, %v346_v41, 0 }
 0x450   :  { %360 = vmatpush.bf16.msra.mxu3 %v351_v43 }
 0x451   :  { %v1712_v45 = vpop.eup %1711 }
 0x452   :  { %v334_v46 = vsel %vm170_vm5, %v1712_v45, 0.0 }
 0x453   :  { %407 = vadd.xlane.f32.xlu0 %v406_v44 }
 0x45b   :  { %335 = vadd.xlane.f32.xlu0 %v334_v46 }
 0x4a5   :  { %v405_v47 = vpop.xlane.xlu2 %404 }
 0x4ad   :  { %v415_v48 = vpop.permute.xlu2 %414 }
 0x4ae   :  { %v420_v49 = vsel %vm200_vm3, %v415_v48, 0  ;;  %v256_v50 = vpop.xlane.xlu0 %255 }
 0x4af   :  { %429 = vmatpush.bf16.msra.mxu2 %v420_v49  ;;  %1713 = vrcp.f32 %v256_v50 }
 0x4b5   :  { %v1714_v52 = vpop.eup %1713 }
 0x4b6   :  { %v259_v51 = vpop.xlane.xlu0 %258  ;;  %v262_v54 = vmul.f32 %v1714_v52, %v1706_v26 }
 0x4b7   :  { %1715 = vrcp.f32 %v259_v51 }
 0x4bd   :  { %v1716_v53 = vpop.eup %1715 }
 0x4be   :  { %v263_v55 = vmul.f32 %v1716_v53, %v1708_v30  ;;  %v327_v56 = vpop.xlane.xlu0 %326  ;;  %v1845_v53 = vmov 32.0  }
 0x4bf   :  { %v329_v57 = vsub.f32 %v319_v36, %v327_v56 }
 0x4c0   :  { %v264_v58 = vpack.c.bf16 %v263_v55, %v262_v54 }
 0x4c1   :  { %v332_v59 = vmul.f32 1.442695, %v329_v57 }
 0x4c2   :  { %1514 = vmatmul.msk.bf16.vlgmr.msrb.gmra.mxu2 %vm170_vm5, %v264_v58 }
 0x4c3   :  { %1717 = vpow2.f32 %v332_v59 }
 0x4c4   :  { %1719 = vrcp.f32 %v405_v47 }
 0x4c6   :  { %v408_v60 = vpop.xlane.xlu0 %407 }
 0x4c7   :  { %1721 = vrcp.f32 %v408_v60 }
 0x4c9   :  { %v1718_v61 = vpop.eup %1717 }
 0x4ca   :  { %v337_v62 = vsel %vm174_vm6, %v1718_v61, 0.0  ;;  %v1720_v63 = vpop.eup %1719 }
 0x4cb   :  { %338 = vadd.xlane.f32.xlu0 %v337_v62  ;;  %v411_v2 = vmul.f32 %v1720_v63, %v2009_v21  ;;  %v1649_v21 = vld [vmem:[%s2288_s5 + $0x8] sm:$0xff] }
 0x4cc   :  { %485 = vmatpush.bf16.msra.mxu0 %v1649_v21 }
 0x4cd   :  { %v1722_v0 = vpop.eup %1721 }
 0x4ce   :  { %v412_v4 = vmul.f32 %v1722_v0, %v1710_v42  ;;  %v336_v6 = vpop.xlane.xlu0 %335 }
 0x4cf   :  { %1723 = vrcp.f32 %v336_v6 }
 0x4d0   :  { %v413_v5 = vpack.c.bf16 %v412_v4, %v411_v2  ;;  %486 = vmatpush.bf16.msra.mxu0 %v1648_v22 }
 0x4d2   :  { %1518 = vmatmul.msk.bf16.vlgmr.msra.gmra.mxu2 %vm170_vm5, %v413_v5 }
 0x4d5   :  { %v1724_v8 = vpop.eup %1723 }
 0x4d6   :  { %v342_v11 = vmul.f32 %v1724_v8, %v1712_v45 }
 0x53e   :  { %v339_v7 = vpop.xlane.xlu0 %338 }
 0x53f   :  { %1725 = vrcp.f32 %v339_v7 }
 0x540   :  { %1727 = vrcp.f32 %v1845_v53 }
 0x545   :  { %v1726_v9 = vpop.eup %1725  ;;  %v282_v10 = vpop.f32.mrf.mxu2 }
 0x546   :  { %v343_v12 = vmul.f32 %v1726_v9, %v1718_v61  ;;  %289 = vrot.lane.b32.xlu1 %v282_v10, %s1844_s13  ;;  %v1651_v10 = vld [vmem:[%s2289_s6 + $0x8] sm:$0xff] }
 0x547   :  { %615 = vmatpush.bf16.msrb.mxu3 %v1651_v10 }
 0x548   :  { %v344_v15 = vpack.c.bf16 %v343_v12, %v342_v11 }
 0x54a   :  { %1516 = vmatmul.msk.bf16.vlgmr.msra.gmra.mxu3 %vm170_vm5, %v344_v15  ;;  %v1650_v15 = vld [vmem:[%s2289_s6] sm:$0xff] }
 0x54b   :  { %616 = vmatpush.bf16.msrb.mxu3 %v1650_v15 }
 0x54d   :  { %v284_v16 = vpop.f32.mrf.mxu2 }
 0x555   :  { %v431_v17 = vpop.f32.mrf.mxu2 }
 0x556   :  { %v1680_v19 = vpack.i.bf16 %v284_v16, %v431_v17 }
 0x558   :  { %1681 = vrot.lane.b32.xlu0 %v1680_v19, %s1844_s13 }
 0x55d   :  { %v433_v20 = vpop.f32.mrf.mxu2 }
 0x55e   :  { %440 = vrot.lane.b32.xlu2 %v433_v20, %s1844_s13 }
 0x5b8   :  { %v290_v27 = vpop.permute.xlu1 %289  ;;  %v441_v35 = vpop.permute.xlu2 %440 }
 0x5b9   :  { %v295_v31 = vsel %vm149_vm4, %v1996_v1, %v290_v27 }
 0x5ca   :  { %v1682_v23 = vpop.permute.xlu0 %1681 }
 0x5cb   :  { %v1683_v24 = vunpack.i.l.bf16 %v1682_v23  ;;  %v1684_v25 = vunpack.i.h.bf16 %v1682_v23 }
 0x5cd   :  { %v362_v26 = vpop.f32.mrf.mxu3  ;;  %v296_v30 = vsel %vm149_vm4, %v1998_v3, %v1684_v25  ;;  %v2050_v3 = vld [vmem:[%s2292_s9] sm:$0x3f] }
 0x5ce   :  { %v444_v28 = vsel %vm149_vm4, %v362_v26, %v1683_v24  ;;  %v460_v1 = vperm.slane %v2050_v3, 0  ;;  %v640_v10 = vperm.slane %v2050_v3, 1 }
 0x5cf   :  { %v448_v29 = vrot.slane %v444_v28, 4 }
 0x5d1   :  { %v453_v32 = vsel %vm75_vm0, %v296_v30, %v448_v29 }
 0x5d2   :  { %v454_v33 = vpack.c.bf16 %v453_v32, %v295_v31 }
 0x5d4   :  { %1527 = vmatmul.msk.bf16.vlgmr.msra.gmra.mxu0 %vm120_vm2, %v454_v33 }
 0x5d5   :  { %v364_v34 = vpop.f32.mrf.mxu3 }
 0x5d6   :  { %v445_v36 = vsel %vm149_vm4, %v364_v34, %v441_v35 }
 0x5d7   :  { %v449_v37 = vrot.slane %v445_v36, 4 }
 0x5d9   :  { %v450_v38 = vsel %vm75_vm0, %v448_v29, %v449_v37  ;;  %v573_v37 = vperm.slane %v2050_v3, 2 }
 0x5da   :  { %v455_v39 = vpack.c.bf16 %v450_v38, %v450_v38 }
 0x5e4   :  { %1528 = vmatmul.msk.bf16.gmra.mxu0 %vm120_vm2, %v455_v39 }
 0x651   :  { %v488_v40 = vpop.f32.mrf.mxu0 }
 0x652   :  { %v489_v41 = vadd.f32 %v488_v40, %v460_v1 }
 0x654   :  { %v497_v42 = vadd.f32 %v489_v41, %v1944_v13  ;;  %v1728_v13 = vpop.eup %1727 }
 0x655   :  { %v510_v54 = vmul.f32 32.0, %v1728_v13  ;;  %vm514_vm7 = vweird.f32 %v1728_v13 }
 0x656   :  { %v500_v43 = vsel %vm120_vm2, %v497_v42, 0.0 }
 0x657   :  { %501 = vadd.xlane.f32.xlu1 %v500_v43  ;;  %v511_v55 = vsub.f32 1.0, %v510_v54 }
 0x659   :  { %v490_v44 = vpop.f32.mrf.mxu0  ;;  %v512_v56 = vmul.f32 %v1728_v13, %v511_v55 }
 0x65a   :  { %v491_v45 = vadd.f32 %v490_v44, %v460_v1 }
 0x65b   :  { %v513_v57 = vadd.f32 %v1728_v13, %v512_v56  ;;  %v1655_v56 = vld [vmem:[%s2291_s8 + $0x18] sm:$0xff] }
 0x65c   :  { %v498_v46 = vadd.f32 %v491_v45, %v1946_v14  ;;  %676 = vmatpush.bf16.msra.mxu1 %v1655_v56 }
 0x65d   :  { %v2059_v14 = vsel %vm514_vm7, %v1728_v13, %v513_v57  ;;  %v1654_v57 = vld [vmem:[%s2291_s8 + $0x10] sm:$0xff]  ;;  %vm665_vm7 = vcmask 523264  }
 0x65e   :  { %v503_v47 = vsel %vm120_vm2, %v498_v46, 0.0 }
 0x65f   :  { %504 = vadd.xlane.f32.xlu2 %v503_v47 }
 0x660   :  { %677 = vmatpush.bf16.msra.mxu1 %v1654_v57 }
 0x661   :  { %v493_v48 = vpop.f32.mrf.mxu0 }
 0x662   :  { %v494_v49 = vadd.f32 %v493_v48, %v460_v1 }
 0x664   :  { %v499_v50 = vadd.f32 %v494_v49, %v1954_v18 }
 0x666   :  { %v506_v51 = vsel %vm120_vm2, %v499_v50, 0.0 }
 0x667   :  { %507 = vadd.xlane.f32.xlu0 %v506_v51 }
 0x669   :  { %v495_v52 = vpop.f32.mrf.mxu0 }
 0x6ca   :  { %v502_v58 = vpop.xlane.xlu1 %501 }
 0x6cb   :  { %v516_v59 = vmul.f32 %v2059_v14, %v502_v58  ;;  %v1653_v58 = vld [vmem:[%s2291_s8 + $0x8] sm:$0xff] }
 0x6cc   :  { %678 = vmatpush.bf16.msra.mxu1 %v1653_v58 }
 0x6cd   :  { %v519_v60 = vsub.f32 %v497_v42, %v516_v59  ;;  %v577_v42 = vperm.slane %v2050_v3, 3  ;;  %v1652_v59 = vld [vmem:[%s2291_s8] sm:$0xff] }
 0x6cf   :  { %v522_v61 = vmul.f32 %v519_v60, %v519_v60 }
 0x6d0   :  { %679 = vmatpush.bf16.msra.mxu1 %v1652_v59 }
 0x6d1   :  { %v525_v18 = vsel %vm120_vm2, %v522_v61, 0.0  ;;  %v1691_v61 = vld [vmem:[%s2290_s7] ss:$0 sm:$0xff] }
 0x6d2   :  { %v505_v62 = vpop.xlane.xlu2 %504  ;;  %526 = vadd.xlane.f32.xlu1 %v525_v18 }
 0x6d3   :  { %v517_v63 = vmul.f32 %v2059_v14, %v505_v62 }
 0x6d5   :  { %v520_v0 = vsub.f32 %v498_v46, %v517_v63 }
 0x6d7   :  { %v523_v2 = vmul.f32 %v520_v0, %v520_v0 }
 0x6d9   :  { %v528_v4 = vsel %vm120_vm2, %v523_v2, 0.0 }
 0x6da   :  { %v508_v5 = vpop.xlane.xlu0 %507  ;;  %529 = vadd.xlane.f32.xlu2 %v528_v4 }
 0x6db   :  { %v518_v6 = vmul.f32 %v2059_v14, %v508_v5 }
 0x6dd   :  { %v521_v7 = vsub.f32 %v499_v50, %v518_v6 }
 0x6df   :  { %v524_v8 = vmul.f32 %v521_v7, %v521_v7 }
 0x6e1   :  { %v531_v9 = vsel %vm120_vm2, %v524_v8, 0.0 }
 0x6e2   :  { %532 = vadd.xlane.f32.xlu1 %v531_v9 }
 0x745   :  { %v527_v11 = vpop.xlane.xlu1 %526 }
 0x746   :  { %v534_v12 = vmul.f32 %v527_v11, %v2059_v14 }
 0x748   :  { %v537_v16 = vadd.f32 1e-05, %v534_v12 }
 0x74a   :  { %1729 = vrsqrt.f32 %v537_v16  ;;  %vm546_vm9 = vweird.f32 %v537_v16 }
 0x74d   :  { %v530_v17 = vpop.xlane.xlu2 %529 }
 0x74e   :  { %v535_v19 = vmul.f32 %v530_v17, %v2059_v14 }
 0x750   :  { %v1730_v20 = vpop.eup %1729  ;;  %v538_v21 = vadd.f32 1e-05, %v535_v19 }
 0x751   :  { %v541_v22 = vmul.f32 %v1730_v20, %v537_v16  ;;  %vm547_vm8 = vweird.f32 %v1730_v20 }
 0x752   :  { %1731 = vrsqrt.f32 %v538_v21  ;;  %vm548_vm10 = vmor %vm546_vm9, %vm547_vm8  ;;  %vm556_vm12 = vweird.f32 %v538_v21 }
 0x753   :  { %v542_v23 = vmul.f32 %v1730_v20, %v541_v22 }
 0x755   :  { %v543_v24 = vmul.f32 0.5, %v542_v23  ;;  %v533_v25 = vpop.xlane.xlu1 %532 }
 0x756   :  { %v536_v26 = vmul.f32 %v533_v25, %v2059_v14 }
 0x757   :  { %v544_v27 = vsub.f32 1.5, %v543_v24 }
 0x758   :  { %v1732_v28 = vpop.eup %1731  ;;  %v539_v29 = vadd.f32 1e-05, %v536_v26 }
 0x759   :  { %v545_v30 = vmul.f32 %v1730_v20, %v544_v27  ;;  %v551_v31 = vmul.f32 %v1732_v28, %v538_v21  ;;  %vm557_vm11 = vweird.f32 %v1732_v28 }
 0x75a   :  { %1733 = vrsqrt.f32 %v539_v29  ;;  %vm558_vm13 = vmor %vm556_vm12, %vm557_vm11  ;;  %vm566_vm15 = vweird.f32 %v539_v29 }
 0x75b   :  { %v552_v32 = vmul.f32 %v1732_v28, %v551_v31  ;;  %v549_v33 = vsel %vm548_vm10, %v1730_v20, %v545_v30 }
 0x75c   :  { %v570_v38 = vmul.f32 %v549_v33, %v519_v60 }
 0x75d   :  { %v553_v34 = vmul.f32 0.5, %v552_v32 }
 0x75e   :  { %v574_v43 = vmul.f32 %v573_v37, %v570_v38 }
 0x75f   :  { %v554_v35 = vsub.f32 1.5, %v553_v34 }
 0x760   :  { %v1734_v36 = vpop.eup %1733  ;;  %v578_v48 = vadd.f32 %v577_v42, %v574_v43 }
 0x761   :  { %v555_v39 = vmul.f32 %v1732_v28, %v554_v35  ;;  %v561_v1 = vmul.f32 %v1734_v36, %v539_v29  ;;  %vm567_vm14 = vweird.f32 %v1734_v36 }
 0x762   :  { %vm568_vm1 = vmor %vm566_vm15, %vm567_vm14 }
 0x763   :  { %v559_v40 = vsel %vm558_vm13, %v1732_v28, %v555_v39  ;;  %v562_v41 = vmul.f32 %v1734_v36, %v561_v1 }
 0x764   :  { %v571_v44 = vmul.f32 %v559_v40, %v520_v0 }
 0x765   :  { %v563_v45 = vmul.f32 0.5, %v562_v41  ;;  %v1657_v41 = vld [vmem:[%s2286_s3 + $0x18] sm:$0xff] }
 0x766   :  { %v575_v46 = vmul.f32 %v573_v37, %v571_v44  ;;  %805 = vmatpush.bf16.msrb.mxu2 %v1657_v41  ;;  %v1656_v44 = vld [vmem:[%s2286_s3 + $0x10] sm:$0xff]  ;;  %s1847_s3 = smov 128  }
 0x767   :  { %v564_v47 = vsub.f32 1.5, %v563_v45 }
 0x768   :  { %v579_v49 = vadd.f32 %v577_v42, %v575_v46 }
 0x769   :  { %v565_v50 = vmul.f32 %v1734_v36, %v564_v47 }
 0x76a   :  { %v581_v51 = vpack.c.bf16 %v579_v49, %v578_v48  ;;  %806 = vmatpush.bf16.msrb.mxu2 %v1656_v44 }
 0x76b   :  { %v569_v52 = vsel %vm568_vm1, %v1734_v36, %v565_v50 }
 0x76c   :  { %1537 = vmatmul.msk.bf16.vlgmr.msrb.gmra.mxu3 %vm120_vm2, %v581_v51  ;;  %v572_v53 = vmul.f32 %v569_v52, %v521_v7 }
 0x76e   :  { %v576_v13 = vmul.f32 %v573_v37, %v572_v53 }
 0x770   :  { %v580_v54 = vadd.f32 %v577_v42, %v576_v13 }
 0x772   :  { %v582_v55 = vpack.c.bf16 %v580_v54, %v580_v54 }
 0x77c   :  { %1538 = vmatmul.msk.bf16.gmra.mxu3 %vm120_vm2, %v582_v55 }
 0x7ef   :  { %v618_v60 = vpop.f32.mrf.mxu3 }
 0x7f0   :  { %v619_v18 = vadd.f32 %v1691_v61, %v618_v60 }
 0x7f2   :  { %v627_v0 = vmax.f32 %v619_v18, 0.0 }
 0x7f7   :  { %v620_v62 = vpop.f32.mrf.mxu3 }
 0x7f8   :  { %v621_v63 = vadd.f32 %v1691_v61, %v620_v62 }
 0x7fa   :  { %v628_v2 = vmax.f32 %v621_v63, 0.0  ;;  %v759_v63 = vperm.slane %v2050_v3, 4 }
 0x7fc   :  { %v630_v4 = vpack.c.bf16 %v628_v2, %v627_v0 }
 0x7fe   :  { %1555 = vmatmul.msk.bf16.vlgmr.msra.gmra.mxu1 %vm665_vm7, %v630_v4 }
 0x7ff   :  { %v623_v5 = vpop.f32.mrf.mxu3 }
 0x800   :  { %v624_v6 = vadd.f32 %v1691_v61, %v623_v5 }
 0x802   :  { %v629_v8 = vmax.f32 %v624_v6, 0.0 }
 0x804   :  { %v631_v9 = vpack.c.bf16 %v629_v8, %v629_v8 }
 0x807   :  { %v625_v7 = vpop.f32.mrf.mxu3 }
 0x808   :  { %v763_v7 = vperm.slane %v2050_v3, 5 }
 0x80e   :  { %1556 = vmatmul.msk.bf16.gmra.mxu1 %vm665_vm7, %v631_v9 }
 0x87b   :  { %v681_v11 = vpop.f32.mrf.mxu1 }
 0x87c   :  { %v682_v12 = vadd.f32 %v681_v11, %v640_v10 }
 0x87e   :  { %v690_v15 = vadd.f32 %v682_v12, %v578_v48 }
 0x880   :  { %v693_v16 = vsel %vm120_vm2, %v690_v15, 0.0 }
 0x881   :  { %694 = vadd.xlane.f32.xlu0 %v693_v16 }
 0x883   :  { %v683_v17 = vpop.f32.mrf.mxu1 }
 0x884   :  { %v684_v19 = vadd.f32 %v683_v17, %v640_v10 }
 0x886   :  { %v691_v20 = vadd.f32 %v684_v19, %v579_v49 }
 0x888   :  { %v696_v21 = vsel %vm120_vm2, %v691_v20, 0.0 }
 0x889   :  { %697 = vadd.xlane.f32.xlu2 %v696_v21 }
 0x88b   :  { %v686_v22 = vpop.f32.mrf.mxu1 }
 0x88c   :  { %v687_v23 = vadd.f32 %v686_v22, %v640_v10 }
 0x88e   :  { %v692_v24 = vadd.f32 %v687_v23, %v580_v54 }
 0x890   :  { %v699_v25 = vsel %vm120_vm2, %v692_v24, 0.0 }
 0x891   :  { %700 = vadd.xlane.f32.xlu1 %v699_v25  ;;  %v1692_v25 = vld [vmem:[%s2287_s4 + $0x1] ss:$0 sm:$0xff] }
 0x893   :  { %v688_v26 = vpop.f32.mrf.mxu1 }
 0x8f4   :  { %v695_v27 = vpop.xlane.xlu0 %694 }
 0x8f5   :  { %v702_v28 = vmul.f32 %v695_v27, %v2059_v14 }
 0x8f7   :  { %v705_v29 = vsub.f32 %v690_v15, %v702_v28 }
 0x8f9   :  { %v708_v30 = vmul.f32 %v705_v29, %v705_v29 }
 0x8fb   :  { %v711_v31 = vsel %vm120_vm2, %v708_v30, 0.0 }
 0x8fc   :  { %v698_v32 = vpop.xlane.xlu2 %697  ;;  %712 = vadd.xlane.f32.xlu0 %v711_v31 }
 0x8fd   :  { %v703_v33 = vmul.f32 %v698_v32, %v2059_v14 }
 0x8ff   :  { %v706_v34 = vsub.f32 %v691_v20, %v703_v33 }
 0x901   :  { %v709_v35 = vmul.f32 %v706_v34, %v706_v34 }
 0x903   :  { %v714_v36 = vsel %vm120_vm2, %v709_v35, 0.0 }
 0x904   :  { %715 = vadd.xlane.f32.xlu2 %v714_v36  ;;  %v701_v37 = vpop.xlane.xlu1 %700 }
 0x905   :  { %v704_v38 = vmul.f32 %v701_v37, %v2059_v14 }
 0x907   :  { %v707_v39 = vsub.f32 %v692_v24, %v704_v38 }
 0x909   :  { %v710_v1 = vmul.f32 %v707_v39, %v707_v39 }
 0x90b   :  { %v717_v40 = vsel %vm120_vm2, %v710_v1, 0.0 }
 0x90c   :  { %718 = vadd.xlane.f32.xlu1 %v717_v40 }
 0x96f   :  { %v713_v42 = vpop.xlane.xlu0 %712 }
 0x970   :  { %v720_v43 = vmul.f32 %v713_v42, %v2059_v14 }
 0x972   :  { %v723_v45 = vadd.f32 1e-05, %v720_v43 }
 0x974   :  { %1735 = vrsqrt.f32 %v723_v45  ;;  %vm732_vm9 = vweird.f32 %v723_v45 }
 0x977   :  { %v716_v46 = vpop.xlane.xlu2 %715 }
 0x978   :  { %v721_v47 = vmul.f32 %v716_v46, %v2059_v14 }
 0x97a   :  { %v1736_v48 = vpop.eup %1735  ;;  %v724_v49 = vadd.f32 1e-05, %v721_v47 }
 0x97b   :  { %v727_v50 = vmul.f32 %v1736_v48, %v723_v45  ;;  %vm733_vm8 = vweird.f32 %v1736_v48 }
 0x97c   :  { %1737 = vrsqrt.f32 %v724_v49  ;;  %vm734_vm10 = vmor %vm732_vm9, %vm733_vm8  ;;  %vm742_vm12 = vweird.f32 %v724_v49 }
 0x97d   :  { %v728_v51 = vmul.f32 %v1736_v48, %v727_v50 }
 0x97f   :  { %v729_v52 = vmul.f32 0.5, %v728_v51  ;;  %v719_v53 = vpop.xlane.xlu1 %718 }
 0x980   :  { %v722_v13 = vmul.f32 %v719_v53, %v2059_v14 }
 0x981   :  { %v730_v54 = vsub.f32 1.5, %v729_v52 }
 0x982   :  { %v1738_v55 = vpop.eup %1737  ;;  %v725_v56 = vadd.f32 1e-05, %v722_v13 }
 0x983   :  { %v731_v57 = vmul.f32 %v1736_v48, %v730_v54  ;;  %v737_v58 = vmul.f32 %v1738_v55, %v724_v49  ;;  %vm743_vm11 = vweird.f32 %v1738_v55 }
 0x984   :  { %1739 = vrsqrt.f32 %v725_v56  ;;  %vm744_vm13 = vmor %vm742_vm12, %vm743_vm11  ;;  %vm752_vm15 = vweird.f32 %v725_v56 }
 0x985   :  { %v738_v59 = vmul.f32 %v1738_v55, %v737_v58  ;;  %v735_v60 = vsel %vm734_vm10, %v1736_v48, %v731_v57 }
 0x986   :  { %v756_v0 = vmul.f32 %v735_v60, %v705_v29 }
 0x987   :  { %v739_v61 = vmul.f32 0.5, %v738_v59 }
 0x988   :  { %v760_v8 = vmul.f32 %v759_v63, %v756_v0 }
 0x989   :  { %v740_v18 = vsub.f32 1.5, %v739_v61 }
 0x98a   :  { %v1740_v62 = vpop.eup %1739  ;;  %v2118_v15 = vadd.f32 %v763_v7, %v760_v8 }
 0x98b   :  { %v741_v2 = vmul.f32 %v1738_v55, %v740_v18  ;;  %v747_v4 = vmul.f32 %v1740_v62, %v725_v56  ;;  %vm753_vm14 = vweird.f32 %v1740_v62 }
 0x98c   :  { %vm754_vm1 = vmor %vm752_vm15, %vm753_vm14 }
 0x98d   :  { %v745_v5 = vsel %vm744_vm13, %v1738_v55, %v741_v2  ;;  %v748_v6 = vmul.f32 %v1740_v62, %v747_v4 }
 0x98e   :  { %v757_v9 = vmul.f32 %v745_v5, %v706_v34 }
 0x98f   :  { %v749_v10 = vmul.f32 0.5, %v748_v6 }
 0x990   :  { %v761_v11 = vmul.f32 %v759_v63, %v757_v9 }
 0x991   :  { %v750_v12 = vsub.f32 1.5, %v749_v10 }
 0x992   :  { %v2120_v16 = vadd.f32 %v763_v7, %v761_v11 }
 0x993   :  { %v751_v17 = vmul.f32 %v1740_v62, %v750_v12 }
 0x994   :  { %v769_v19 = vpack.c.bf16 %v2120_v16, %v2118_v15 }
 0x995   :  { %v755_v20 = vsel %vm754_vm1, %v1740_v62, %v751_v17 }
 0x996   :  { %1571 = vmatmul.msk.bf16.vlgmr.msrb.gmra.mxu2 %vm120_vm2, %v769_v19  ;;  %v758_v3 = vmul.f32 %v755_v20, %v707_v39 }
 0x998   :  { %v762_v21 = vmul.f32 %v759_v63, %v758_v3 }
 0x99a   :  { %v2125_v22 = vadd.f32 %v763_v7, %v762_v21 }
 0x99c   :  { %v770_v23 = vpack.c.bf16 %v2125_v22, %v2125_v22 }
 0x9a6   :  { %1572 = vmatmul.msk.bf16.gmra.mxu2 %vm120_vm2, %v770_v23 }
 0xa19   :  { %v808_v24 = vpop.f32.mrf.mxu2 }
 0xa1a   :  { %v809_v27 = vadd.f32 %v1692_v25, %v808_v24 }
 0xa21   :  { %v810_v26 = vpop.f32.mrf.mxu2 }
 0xa22   :  { %v811_v28 = vadd.f32 %v1692_v25, %v810_v26 }
 0xa24   :  { %v2133_v29 = vpack.c.bf16 %v811_v28, %v809_v27 }
 0xa26   :  { %886 = vrot.lane.b32.xlu2 %v2133_v29, %s1842_s29  ;;  %888 = vrot.lane.b32.xlu0 %v2133_v29, %s1841_s28 }
 0xa29   :  { %v813_v30 = vpop.f32.mrf.mxu2 }
 0xa2a   :  { %v814_v31 = vadd.f32 %v1692_v25, %v813_v30 }
 0xa2c   :  { %v965_v32 = vpack.c.bf16 %v814_v31, %v811_v28 }
 0xa2e   :  { %v2139_v33 = vrot.slane %v965_v32, 2  ;;  %819 = vrot.lane.b32.xlu2 %v2133_v29, %s1840_s1 }
 0xa30   :  { %1035 = vrot.lane.b32.xlu0 %v2139_v33, %s1842_s29  ;;  %1037 = vrot.lane.b32.xlu1 %v2139_v33, %s1841_s28 }
 0xa31   :  { %v815_v34 = vpop.f32.mrf.mxu2 }
 0xa38   :  { %968 = vrot.lane.b32.xlu0 %v2139_v33, %s1840_s1 }
 0xa80   :  { %v887_v35 = vpop.permute.xlu2 %886 }
 0xa88   :  { %v820_v36 = vpop.permute.xlu2 %819 }
 0xa89   :  { %v825_v37 = vsel %vm149_vm4, %v820_v36, 0 }
 0xa8a   :  { %834 = vmatpush.bf16.xpose.msrb.mxu0 %v825_v37 }
 0xa91   :  { %1573 = vmatmul.msk.bf16.vlgmr.msrb.gmra.mxu0 %vm149_vm4, %v2133_v29 }
 0xa98   :  { %v889_v38 = vpop.permute.xlu0 %888 }
 0xa99   :  { %v894_v39 = vsel %vm149_vm4, %v889_v38, 0 }
 0xa9a   :  { %903 = vmatpush.bf16.xpose.msrb.mxu1 %v894_v39 }
 0xaa1   :  { %1575 = vmatmul.msk.bf16.vlgmr.msrb.gmra.mxu1 %vm149_vm4, %v887_v35 }
 0xaa2   :  { %v1036_v1 = vpop.permute.xlu0 %1035  ;;  %v1038_v40 = vpop.permute.xlu1 %1037 }
 0xaa3   :  { %v1043_v41 = vsel %vm149_vm4, %v1038_v40, 0 }
 0xaa4   :  { %1052 = vmatpush.bf16.xpose.msra.mxu1 %v1043_v41 }
 0xaaa   :  { %v969_v42 = vpop.permute.xlu0 %968 }
 0xaab   :  { %v974_v43 = vsel %vm149_vm4, %v969_v42, 0 }
 0xaac   :  { %983 = vmatpush.bf16.xpose.msra.mxu0 %v974_v43 }
 0xab1   :  { %1579 = vmatmul.msk.bf16.vlgmr.msra.gmra.mxu1 %vm149_vm4, %v1036_v1 }
 0xab3   :  { %1577 = vmatmul.msk.bf16.vlgmr.msra.gmra.mxu0 %vm149_vm4, %v2139_v33 }
 0xb0e   :  { %v836_v48 = vpop.f32.mrf.mxu0 }
 0xb0f   :  { %v841_v50 = vsel %vm170_vm5, %v836_v48, -inf }
 0xb16   :  { %v838_v52 = vpop.f32.mrf.mxu0 }
 0xb17   :  { %v844_v13 = vsel %vm174_vm6, %v838_v52, -inf }
 0xb1e   :  { %v905_v44 = vpop.f32.mrf.mxu1 }
 0xb1f   :  { %v910_v45 = vsel %vm170_vm5, %v905_v44, -inf }
 0xb20   :  { %911 = vmax.xlane.f32.xlu1 %v910_v45 }
 0xb26   :  { %v907_v46 = vpop.f32.mrf.mxu1 }
 0xb27   :  { %v913_v47 = vsel %vm174_vm6, %v907_v46, -inf }
 0xb28   :  { %914 = vmax.xlane.f32.xlu2 %v913_v47 }
 0xb2e   :  { %v1054_v49 = vpop.f32.mrf.mxu1 }
 0xb2f   :  { %v1059_v51 = vsel %vm170_vm5, %v1054_v49, -inf }
 0xb30   :  { %842 = vmax.xlane.f32.xlu2 %v841_v50  ;;  %1060 = vmax.xlane.f32.xlu0 %v1059_v51  ;;  %v985_v55 = vpop.f32.mrf.mxu0 }
 0xb31   :  { %v990_v56 = vsel %vm170_vm5, %v985_v55, -inf }
 0xb36   :  { %v1056_v53 = vpop.f32.mrf.mxu1 }
 0xb37   :  { %v1062_v54 = vsel %vm174_vm6, %v1056_v53, -inf }
 0xb38   :  { %845 = vmax.xlane.f32.xlu0 %v844_v13  ;;  %1063 = vmax.xlane.f32.xlu1 %v1062_v54  ;;  %v987_v2 = vpop.f32.mrf.mxu0 }
 0xb39   :  { %v993_v8 = vsel %vm174_vm6, %v987_v2, -inf }
 0xb40   :  { %991 = vmax.xlane.f32.xlu0 %v990_v56 }
 0xb93   :  { %v912_v57 = vpop.xlane.xlu1 %911 }
 0xb94   :  { %v916_v58 = vsub.f32 %v905_v44, %v912_v57 }
 0xb96   :  { %v918_v59 = vmul.f32 1.442695, %v916_v58 }
 0xb98   :  { %1741 = vpow2.f32 %v918_v59 }
 0xb9b   :  { %v915_v60 = vpop.xlane.xlu2 %914 }
 0xb9c   :  { %v917_v61 = vsub.f32 %v907_v46, %v915_v60 }
 0xb9e   :  { %v1742_v18 = vpop.eup %1741  ;;  %v920_v62 = vmul.f32 1.442695, %v917_v61 }
 0xb9f   :  { %v922_v63 = vsel %vm170_vm5, %v1742_v18, 0.0 }
 0xba0   :  { %1743 = vpow2.f32 %v920_v62  ;;  %923 = vadd.xlane.f32.xlu1 %v922_v63 }
 0xba3   :  { %v1061_v0 = vpop.xlane.xlu0 %1060  ;;  %v843_v10 = vpop.xlane.xlu2 %842 }
 0xba4   :  { %v1065_v4 = vsub.f32 %v1054_v49, %v1061_v0  ;;  %v847_v19 = vsub.f32 %v836_v48, %v843_v10 }
 0xba6   :  { %v1744_v5 = vpop.eup %1743  ;;  %v1067_v6 = vmul.f32 1.442695, %v1065_v4  ;;  %v849_v21 = vmul.f32 1.442695, %v847_v19 }
 0xba7   :  { %v925_v7 = vsel %vm174_vm6, %v1744_v5, 0.0 }
 0xba8   :  { %926 = vadd.xlane.f32.xlu2 %v925_v7  ;;  %994 = vmax.xlane.f32.xlu1 %v993_v8  ;;  %1745 = vpow2.f32 %v1067_v6 }
 0xbab   :  { %v1064_v9 = vpop.xlane.xlu1 %1063  ;;  %v846_v3 = vpop.xlane.xlu0 %845 }
 0xbac   :  { %v1066_v11 = vsub.f32 %v1056_v53, %v1064_v9  ;;  %v848_v24 = vsub.f32 %v838_v52, %v846_v3 }
 0xbae   :  { %v1069_v12 = vmul.f32 1.442695, %v1066_v11  ;;  %v2169_v17 = vpop.eup %1745  ;;  %v851_v26 = vmul.f32 1.442695, %v848_v24 }
 0xbaf   :  { %v1071_v20 = vsel %vm170_vm5, %v2169_v17, 0.0 }
 0xbb0   :  { %1747 = vpow2.f32 %v1069_v12  ;;  %1072 = vadd.xlane.f32.xlu0 %v1071_v20 }
 0xbb1   :  { %1749 = vpow2.f32 %v849_v21  ;;  %v1659_v21 = vld [vmem:[%s2288_s5 + $0x18] sm:$0xff] }
 0xbb2   :  { %1751 = vpow2.f32 %v851_v26  ;;  %1154 = vmatpush.bf16.msrb.mxu0 %v1659_v21 }
 0xbb3   :  { %v992_v27 = vpop.xlane.xlu0 %991 }
 0xbb4   :  { %v996_v30 = vsub.f32 %v985_v55, %v992_v27 }
 0xbb6   :  { %v1748_v23 = vpop.eup %1747  ;;  %v998_v32 = vmul.f32 1.442695, %v996_v30 }
 0xbb7   :  { %v1074_v25 = vsel %vm174_vm6, %v1748_v23, 0.0  ;;  %v1750_v28 = vpop.eup %1749 }
 0xbb8   :  { %1075 = vadd.xlane.f32.xlu1 %v1074_v25  ;;  %v853_v31 = vsel %vm170_vm5, %v1750_v28, 0.0  ;;  %v1752_v34 = vpop.eup %1751  ;;  %1753 = vpow2.f32 %v998_v32 }
 0xbb9   :  { %v856_v35 = vsel %vm174_vm6, %v1752_v34, 0.0 }
 0xbbe   :  { %v1754_v36 = vpop.eup %1753 }
 0xbbf   :  { %v1002_v37 = vsel %vm170_vm5, %v1754_v36, 0.0 }
 0xbc0   :  { %933 = vrot.lane.b32.xlu2 %v2133_v29, %s1843_s30  ;;  %854 = vadd.xlane.f32.xlu1 %v853_v31 }
 0xbc4   :  { %1082 = vrot.lane.b32.xlu0 %v2139_v33, %s1843_s30 }
 0xbc8   :  { %864 = vrot.lane.b32.xlu2 %v2133_v29, %s1838_s26  ;;  %857 = vadd.xlane.f32.xlu1 %v856_v35 }
 0xbd0   :  { %1013 = vrot.lane.b32.xlu2 %v2139_v33, %s1838_s26  ;;  %1003 = vadd.xlane.f32.xlu1 %v1002_v37 }
 0xc13   :  { %v924_v38 = vpop.xlane.xlu1 %923 }
 0xc14   :  { %1755 = vrcp.f32 %v924_v38 }
 0xc1a   :  { %v1756_v42 = vpop.eup %1755 }
 0xc1b   :  { %v927_v39 = vpop.xlane.xlu2 %926  ;;  %v995_v1 = vpop.xlane.xlu1 %994  ;;  %v930_v43 = vmul.f32 %v1756_v42, %v1742_v18 }
 0xc1c   :  { %1757 = vrcp.f32 %v927_v39  ;;  %v997_v40 = vsub.f32 %v987_v2, %v995_v1 }
 0xc1e   :  { %v1000_v41 = vmul.f32 1.442695, %v997_v40 }
 0xc20   :  { %1759 = vpow2.f32 %v1000_v41 }
 0xc22   :  { %v1758_v29 = vpop.eup %1757 }
 0xc23   :  { %v931_v44 = vmul.f32 %v1758_v29, %v1744_v5  ;;  %v934_v45 = vpop.permute.xlu2 %933  ;;  %v1073_v50 = vpop.xlane.xlu0 %1072 }
 0xc24   :  { %v939_v46 = vsel %vm200_vm3, %v934_v45, 0 }
 0xc25   :  { %v932_v47 = vpack.c.bf16 %v931_v44, %v930_v43  ;;  %948 = vmatpush.bf16.msra.mxu2 %v939_v46  ;;  %v2215_v43 = vld [vmem:[%s2292_s9 + $0x8] sm:$0x3f] }
 0xc26   :  { %v1760_v33 = vpop.eup %1759  ;;  %v1129_v44 = vperm.slane %v2215_v43, 0 }
 0xc27   :  { %v1005_v48 = vsel %vm174_vm6, %v1760_v33, 0.0 }
 0xc28   :  { %1576 = vmatmul.msk.bf16.vlgmr.msra.gmra.mxu2 %vm170_vm5, %v932_v47  ;;  %1006 = vadd.xlane.f32.xlu0 %v1005_v48 }
 0xc2b   :  { %v865_v49 = vpop.permute.xlu2 %864  ;;  %v1076_v52 = vpop.xlane.xlu1 %1075 }
 0xc2c   :  { %v870_v51 = vsel %vm200_vm3, %v865_v49, 0  ;;  %1761 = vrcp.f32 %v1076_v52 }
 0xc2d   :  { %879 = vmatpush.bf16.msra.mxu3 %v870_v51  ;;  %1763 = vrcp.f32 %v1073_v50 }
 0xc32   :  { %v1762_v53 = vpop.eup %1761 }
 0xc33   :  { %v1014_v13 = vpop.permute.xlu2 %1013  ;;  %v855_v55 = vpop.xlane.xlu1 %854  ;;  %v1080_v57 = vmul.f32 %v1762_v53, %v1748_v23  ;;  %v1658_v23 = vld [vmem:[%s2288_s5 + $0x10] sm:$0xff] }
 0xc34   :  { %v1019_v54 = vsel %vm200_vm3, %v1014_v13, 0  ;;  %v1764_v56 = vpop.eup %1763  ;;  %1765 = vrcp.f32 %v855_v55  ;;  %1155 = vmatpush.bf16.msrb.mxu0 %v1658_v23 }
 0xc35   :  { %1028 = vmatpush.bf16.msrb.mxu3 %v1019_v54  ;;  %v1079_v59 = vmul.f32 %v1764_v56, %v2169_v17 }
 0xc36   :  { %v1083_v58 = vpop.permute.xlu0 %1082 }
 0xc37   :  { %v1088_v60 = vsel %vm200_vm3, %v1083_v58, 0  ;;  %v1081_v61 = vpack.c.bf16 %v1080_v57, %v1079_v59 }
 0xc38   :  { %1097 = vmatpush.bf16.msrb.mxu2 %v1088_v60 }
 0xc3a   :  { %v1766_v62 = vpop.eup %1765 }
 0xc3b   :  { %1580 = vmatmul.msk.bf16.vlgmr.msrb.gmra.mxu2 %vm170_vm5, %v1081_v61  ;;  %v858_v18 = vpop.xlane.xlu1 %857  ;;  %v861_v0 = vmul.f32 %v1766_v62, %v1750_v28 }
 0xc3c   :  { %1767 = vrcp.f32 %v858_v18 }
 0xc42   :  { %v1768_v63 = vpop.eup %1767 }
 0xc43   :  { %v862_v2 = vmul.f32 %v1768_v63, %v1752_v34  ;;  %v1004_v5 = vpop.xlane.xlu1 %1003 }
 0xc44   :  { %1769 = vrcp.f32 %v1004_v5  ;;  %v1661_v5 = vld [vmem:[%s2289_s6 + $0x18] sm:$0xff] }
 0xc45   :  { %v863_v4 = vpack.c.bf16 %v862_v2, %v861_v0 }
 0xc47   :  { %1574 = vmatmul.msk.bf16.vlgmr.msra.gmra.mxu3 %vm170_vm5, %v863_v4 }
 0xc48   :  { %1279 = vmatpush.bf16.msra.mxu3 %v1661_v5  ;;  %v1305_v5 = vperm.slane %v2215_v43, 1 }
 0xc4a   :  { %v1770_v7 = vpop.eup %1769 }
 0xc4b   :  { %v1010_v9 = vmul.f32 %v1770_v7, %v1754_v36 }
 0xc9b   :  { %v1007_v6 = vpop.xlane.xlu0 %1006 }
 0xc9c   :  { %1771 = vrcp.f32 %v1007_v6 }
 0xca2   :  { %v1772_v8 = vpop.eup %1771 }
 0xca3   :  { %v1011_v10 = vmul.f32 %v1772_v8, %v1760_v33  ;;  %v1660_v8 = vld [vmem:[%s2289_s6 + $0x10] sm:$0xff] }
 0xca4   :  { %1280 = vmatpush.bf16.msra.mxu3 %v1660_v8 }
 0xca5   :  { %v1012_v11 = vpack.c.bf16 %v1011_v10, %v1010_v9 }
 0xca7   :  { %1578 = vmatmul.msk.bf16.vlgmr.msrb.gmra.mxu3 %vm170_vm5, %v1012_v11 }
 0xcab   :  { %v950_v12 = vpop.f32.mrf.mxu2 }
 0xcac   :  { %957 = vrot.lane.b32.xlu2 %v950_v12, %s1844_s13 }
 0xcb3   :  { %v952_v17 = vpop.f32.mrf.mxu2 }
 0xcbe   :  { %v1099_v19 = vpop.f32.mrf.mxu2 }
 0xcbf   :  { %v1685_v20 = vpack.i.bf16 %v952_v17, %v1099_v19 }
 0xcc1   :  { %1686 = vrot.lane.b32.xlu1 %v1685_v20, %s1844_s13 }
 0xcc6   :  { %v1101_v3 = vpop.f32.mrf.mxu2 }
 0xcc7   :  { %1108 = vrot.lane.b32.xlu2 %v1101_v3, %s1844_s13 }
 0xcca   :  { %v881_v24 = vpop.f32.mrf.mxu3 }
 0xcd2   :  { %v883_v25 = vpop.f32.mrf.mxu3 }
 0xd06   :  { %v958_v31 = vpop.permute.xlu2 %957 }
 0xd07   :  { %v963_v36 = vsel %vm149_vm4, %v881_v24, %v958_v31 }
 0xd21   :  { %v1109_v1 = vpop.permute.xlu2 %1108 }
 0xd2a   :  { %v1030_v30 = vpop.f32.mrf.mxu3 }
 0xd32   :  { %v1032_v39 = vpop.f32.mrf.mxu3 }
 0xd33   :  { %v1687_v26 = vpop.permute.xlu1 %1686  ;;  %v1113_v40 = vsel %vm149_vm4, %v1032_v39, %v1109_v1 }
 0xd34   :  { %v1689_v27 = vunpack.i.h.bf16 %v1687_v26  ;;  %v1688_v28 = vunpack.i.l.bf16 %v1687_v26  ;;  %v1117_v41 = vrot.slane %v1113_v40, 4 }
 0xd36   :  { %v1112_v32 = vsel %vm149_vm4, %v1030_v30, %v1688_v28  ;;  %v964_v35 = vsel %vm149_vm4, %v883_v25, %v1689_v27 }
 0xd37   :  { %v1116_v34 = vrot.slane %v1112_v32, 4 }
 0xd39   :  { %v1121_v37 = vsel %vm75_vm0, %v964_v35, %v1116_v34  ;;  %v1118_v42 = vsel %vm75_vm0, %v1116_v34, %v1117_v41  ;;  %v1239_v41 = vperm.slane %v2215_v43, 3 }
 0xd3a   :  { %v1122_v38 = vpack.c.bf16 %v1121_v37, %v963_v36  ;;  %v1123_v29 = vpack.c.bf16 %v1118_v42, %v1118_v42  ;;  %v1235_v36 = vperm.slane %v2215_v43, 2 }
 0xd3c   :  { %1593 = vmatmul.msk.bf16.vlgmr.msrb.gmra.mxu0 %vm120_vm2, %v1122_v38 }
 0xd4c   :  { %1594 = vmatmul.msk.bf16.gmra.mxu0 %vm120_vm2, %v1123_v29 }
 0xdb9   :  { %v1157_v45 = vpop.f32.mrf.mxu0 }
 0xdba   :  { %v1158_v46 = vadd.f32 %v1157_v45, %v1129_v44 }
 0xdbc   :  { %v1166_v47 = vadd.f32 %v1158_v46, %v2118_v15 }
 0xdbe   :  { %v1169_v33 = vsel %vm120_vm2, %v1166_v47, 0.0 }
 0xdbf   :  { %1170 = vadd.xlane.f32.xlu2 %v1169_v33 }
 0xdc1   :  { %v1159_v48 = vpop.f32.mrf.mxu0 }
 0xdc2   :  { %v1160_v49 = vadd.f32 %v1159_v48, %v1129_v44 }
 0xdc4   :  { %v1167_v50 = vadd.f32 %v1160_v49, %v2120_v16 }
 0xdc6   :  { %v1172_v51 = vsel %vm120_vm2, %v1167_v50, 0.0 }
 0xdc7   :  { %1173 = vadd.xlane.f32.xlu1 %v1172_v51 }
 0xdc9   :  { %v1162_v52 = vpop.f32.mrf.mxu0 }
 0xdca   :  { %v1163_v53 = vadd.f32 %v1162_v52, %v1129_v44 }
 0xdcc   :  { %v1168_v13 = vadd.f32 %v1163_v53, %v2125_v22 }
 0xdce   :  { %v1175_v54 = vsel %vm120_vm2, %v1168_v13, 0.0 }
 0xdcf   :  { %1176 = vadd.xlane.f32.xlu0 %v1175_v54  ;;  %v1665_v54 = vld [vmem:[%s2291_s8 + $0x38] sm:$0xff] }
 0xdd0   :  { %1340 = vmatpush.bf16.msrb.mxu1 %v1665_v54 }
 0xdd1   :  { %v1164_v55 = vpop.f32.mrf.mxu0 }
 0xdd2   :  { %v1664_v55 = vld [vmem:[%s2291_s8 + $0x30] sm:$0xff] }
 0xdd4   :  { %1341 = vmatpush.bf16.msrb.mxu1 %v1664_v55 }
 0xe32   :  { %v1171_v56 = vpop.xlane.xlu2 %1170 }
 0xe33   :  { %v1178_v15 = vmul.f32 %v1171_v56, %v2059_v14  ;;  %v1663_v56 = vld [vmem:[%s2291_s8 + $0x28] sm:$0xff] }
 0xe34   :  { %1342 = vmatpush.bf16.msrb.mxu1 %v1663_v56 }
 0xe35   :  { %v1181_v57 = vsub.f32 %v1166_v47, %v1178_v15  ;;  %v1662_v15 = vld [vmem:[%s2291_s8 + $0x20] sm:$0xff] }
 0xe37   :  { %v1184_v58 = vmul.f32 %v1181_v57, %v1181_v57 }
 0xe38   :  { %1343 = vmatpush.bf16.msrb.mxu1 %v1662_v15 }
 0xe39   :  { %v1187_v59 = vsel %vm120_vm2, %v1184_v58, 0.0  ;;  %v1693_v58 = vld [vmem:[%s2290_s7 + $0x1] ss:$0 sm:$0xff] }
 0xe3a   :  { %v1174_v60 = vpop.xlane.xlu1 %1173  ;;  %1188 = vadd.xlane.f32.xlu0 %v1187_v59 }
 0xe3b   :  { %v1179_v16 = vmul.f32 %v1174_v60, %v2059_v14 }
 0xe3d   :  { %v1182_v61 = vsub.f32 %v1167_v50, %v1179_v16 }
 0xe3f   :  { %v1185_v18 = vmul.f32 %v1182_v61, %v1182_v61 }
 0xe41   :  { %v1190_v62 = vsel %vm120_vm2, %v1185_v18, 0.0 }
 0xe42   :  { %1191 = vadd.xlane.f32.xlu0 %v1190_v62  ;;  %v1177_v22 = vpop.xlane.xlu0 %1176 }
 0xe43   :  { %v1180_v63 = vmul.f32 %v1177_v22, %v2059_v14 }
 0xe45   :  { %v1183_v0 = vsub.f32 %v1168_v13, %v1180_v63 }
 0xe47   :  { %v1186_v2 = vmul.f32 %v1183_v0, %v1183_v0 }
 0xe49   :  { %v1193_v4 = vsel %vm120_vm2, %v1186_v2, 0.0 }
 0xe4a   :  { %1194 = vadd.xlane.f32.xlu0 %v1193_v4 }
 0xead   :  { %v1189_v6 = vpop.xlane.xlu0 %1188 }
 0xeae   :  { %v1196_v7 = vmul.f32 %v1189_v6, %v2059_v14 }
 0xeb0   :  { %v1199_v9 = vadd.f32 1e-05, %v1196_v7 }
 0xeb2   :  { %1773 = vrsqrt.f32 %v1199_v9  ;;  %vm1208_vm3 = vweird.f32 %v1199_v9 }
 0xeb5   :  { %v1192_v10 = vpop.xlane.xlu0 %1191 }
 0xeb6   :  { %v1197_v11 = vmul.f32 %v1192_v10, %v2059_v14 }
 0xeb8   :  { %v1774_v12 = vpop.eup %1773  ;;  %v1200_v17 = vadd.f32 1e-05, %v1197_v11 }
 0xeb9   :  { %v1203_v19 = vmul.f32 %v1774_v12, %v1199_v9  ;;  %vm1209_vm0 = vweird.f32 %v1774_v12 }
 0xeba   :  { %1775 = vrsqrt.f32 %v1200_v17  ;;  %vm1210_vm4 = vmor %vm1208_vm3, %vm1209_vm0  ;;  %vm1218_vm6 = vweird.f32 %v1200_v17 }
 0xebb   :  { %v1204_v20 = vmul.f32 %v1774_v12, %v1203_v19 }
 0xebd   :  { %v1205_v3 = vmul.f32 0.5, %v1204_v20  ;;  %v1195_v21 = vpop.xlane.xlu0 %1194 }
 0xebe   :  { %v1198_v23 = vmul.f32 %v1195_v21, %v2059_v14 }
 0xebf   :  { %v1206_v24 = vsub.f32 1.5, %v1205_v3 }
 0xec0   :  { %v1776_v25 = vpop.eup %1775  ;;  %v1201_v26 = vadd.f32 1e-05, %v1198_v23 }
 0xec1   :  { %v1207_v27 = vmul.f32 %v1774_v12, %v1206_v24  ;;  %v1213_v28 = vmul.f32 %v1776_v25, %v1200_v17  ;;  %vm1219_vm5 = vweird.f32 %v1776_v25 }
 0xec2   :  { %1777 = vrsqrt.f32 %v1201_v26  ;;  %vm1220_vm8 = vmor %vm1218_vm6, %vm1219_vm5  ;;  %vm1228_vm10 = vweird.f32 %v1201_v26 }
 0xec3   :  { %v1214_v30 = vmul.f32 %v1776_v25, %v1213_v28  ;;  %v1211_v31 = vsel %vm1210_vm4, %v1774_v12, %v1207_v27 }
 0xec4   :  { %v1232_v37 = vmul.f32 %v1211_v31, %v1181_v57 }
 0xec5   :  { %v1215_v32 = vmul.f32 0.5, %v1214_v30 }
 0xec6   :  { %v1236_v42 = vmul.f32 %v1235_v36, %v1232_v37 }
 0xec7   :  { %v1216_v34 = vsub.f32 1.5, %v1215_v32 }
 0xec8   :  { %v1778_v35 = vpop.eup %1777  ;;  %v1240_v47 = vadd.f32 %v1239_v41, %v1236_v42 }
 0xec9   :  { %v1217_v38 = vmul.f32 %v1776_v25, %v1216_v34  ;;  %v1223_v39 = vmul.f32 %v1778_v35, %v1201_v26  ;;  %vm1229_vm9 = vweird.f32 %v1778_v35 }
 0xeca   :  { %vm1230_vm11 = vmor %vm1228_vm10, %vm1229_vm9 }
 0xecb   :  { %v1221_v1 = vsel %vm1220_vm8, %v1776_v25, %v1217_v38  ;;  %v1224_v40 = vmul.f32 %v1778_v35, %v1223_v39 }
 0xecc   :  { %v1233_v29 = vmul.f32 %v1221_v1, %v1182_v61 }
 0xecd   :  { %v1225_v44 = vmul.f32 0.5, %v1224_v40  ;;  %v1667_v40 = vld [vmem:[#allocation2 + $0x8] sm:$0xff] }
 0xece   :  { %v1237_v45 = vmul.f32 %v1235_v36, %v1233_v29  ;;  %1465 = vmatpush.bf16.msra.mxu2 %v1667_v40  ;;  %v1666_v29 = vld [vmem:[#allocation2] sm:$0xff] }
 0xecf   :  { %v1226_v46 = vsub.f32 1.5, %v1225_v44 }
 0xed0   :  { %v1241_v33 = vadd.f32 %v1239_v41, %v1237_v45 }
 0xed1   :  { %v1227_v48 = vmul.f32 %v1778_v35, %v1226_v46 }
 0xed2   :  { %v1243_v49 = vpack.c.bf16 %v1241_v33, %v1240_v47  ;;  %1466 = vmatpush.bf16.msra.mxu2 %v1666_v29 }
 0xed3   :  { %v1231_v50 = vsel %vm1230_vm11, %v1778_v35, %v1227_v48 }
 0xed4   :  { %1608 = vmatmul.msk.bf16.vlgmr.msra.gmra.mxu3 %vm120_vm2, %v1243_v49  ;;  %v1234_v51 = vmul.f32 %v1231_v50, %v1183_v0 }
 0xed6   :  { %v1238_v52 = vmul.f32 %v1235_v36, %v1234_v51 }
 0xed8   :  { %v1242_v53 = vadd.f32 %v1239_v41, %v1238_v52 }
 0xeda   :  { %v1244_v13 = vpack.c.bf16 %v1242_v53, %v1242_v53 }
 0xee4   :  { %1609 = vmatmul.msk.bf16.gmra.mxu3 %vm120_vm2, %v1244_v13 }
 0xf57   :  { %v1282_v57 = vpop.f32.mrf.mxu3 }
 0xf58   :  { %v1283_v59 = vadd.f32 %v1693_v58, %v1282_v57 }
 0xf5a   :  { %v1291_v61 = vmax.f32 %v1283_v59, 0.0 }
 0xf5f   :  { %v1284_v60 = vpop.f32.mrf.mxu3 }
 0xf60   :  { %v1285_v16 = vadd.f32 %v1693_v58, %v1284_v60 }
 0xf62   :  { %v1292_v18 = vmax.f32 %v1285_v16, 0.0  ;;  %v1423_v16 = vperm.slane %v2215_v43, 4 }
 0xf64   :  { %v1294_v62 = vpack.c.bf16 %v1292_v18, %v1291_v61 }
 0xf66   :  { %1634 = vmatmul.msk.bf16.vlgmr.msrb.gmra.mxu1 %vm665_vm7, %v1294_v62 }
 0xf67   :  { %v1287_v22 = vpop.f32.mrf.mxu3 }
 0xf68   :  { %v1288_v63 = vadd.f32 %v1693_v58, %v1287_v22 }
 0xf6a   :  { %v1293_v2 = vmax.f32 %v1288_v63, 0.0  ;;  %v1427_v63 = vperm.slane %v2215_v43, 5  ;;  %v1694_v43 = vld [vmem:[%s2294_s11] ss:$0 sm:$0xff] }
 0xf6c   :  { %v1295_v4 = vpack.c.bf16 %v1293_v2, %v1293_v2 }
 0xf6f   :  { %v1289_v0 = vpop.f32.mrf.mxu3 }
 0xf76   :  { %1635 = vmatmul.msk.bf16.gmra.mxu1 %vm665_vm7, %v1295_v4 }
 0xfe3   :  { %v1345_v6 = vpop.f32.mrf.mxu1 }
 0xfe4   :  { %v1346_v7 = vadd.f32 %v1345_v6, %v1305_v5 }
 0xfe6   :  { %v1354_v8 = vadd.f32 %v1346_v7, %v1240_v47 }
 0xfe8   :  { %v1357_v9 = vsel %vm120_vm2, %v1354_v8, 0.0 }
 0xfe9   :  { %1358 = vadd.xlane.f32.xlu2 %v1357_v9 }
 0xfeb   :  { %v1347_v10 = vpop.f32.mrf.mxu1 }
 0xfec   :  { %v1348_v11 = vadd.f32 %v1347_v10, %v1305_v5 }
 0xfee   :  { %v1355_v12 = vadd.f32 %v1348_v11, %v1241_v33 }
 0xff0   :  { %v1360_v17 = vsel %vm120_vm2, %v1355_v12, 0.0 }
 0xff1   :  { %1361 = vadd.xlane.f32.xlu0 %v1360_v17 }
 0xff3   :  { %v1350_v19 = vpop.f32.mrf.mxu1 }
 0xff4   :  { %v1351_v20 = vadd.f32 %v1350_v19, %v1305_v5 }
 0xff6   :  { %v1356_v3 = vadd.f32 %v1351_v20, %v1242_v53 }
 0xff8   :  { %v1363_v21 = vsel %vm120_vm2, %v1356_v3, 0.0 }
 0xff9   :  { %1364 = vadd.xlane.f32.xlu1 %v1363_v21 }
 0xffb   :  { %v1352_v23 = vpop.f32.mrf.mxu1 }
0x105c   :  { %v1359_v24 = vpop.xlane.xlu2 %1358 }
0x105d   :  { %v1366_v25 = vmul.f32 %v1359_v24, %v2059_v14 }
0x105f   :  { %v1369_v26 = vsub.f32 %v1354_v8, %v1366_v25 }
0x1061   :  { %v1372_v27 = vmul.f32 %v1369_v26, %v1369_v26 }
0x1063   :  { %v1375_v28 = vsel %vm120_vm2, %v1372_v27, 0.0 }
0x1064   :  { %1376 = vadd.xlane.f32.xlu2 %v1375_v28  ;;  %v1362_v30 = vpop.xlane.xlu0 %1361 }
0x1065   :  { %v1367_v31 = vmul.f32 %v1362_v30, %v2059_v14 }
0x1067   :  { %v1370_v32 = vsub.f32 %v1355_v12, %v1367_v31 }
0x1069   :  { %v1373_v34 = vmul.f32 %v1370_v32, %v1370_v32 }
0x106b   :  { %v1378_v35 = vsel %vm120_vm2, %v1373_v34, 0.0 }
0x106c   :  { %v1365_v36 = vpop.xlane.xlu1 %1364  ;;  %1379 = vadd.xlane.f32.xlu0 %v1378_v35 }
0x106d   :  { %v1368_v37 = vmul.f32 %v1365_v36, %v2059_v14 }
0x106f   :  { %v1371_v38 = vsub.f32 %v1356_v3, %v1368_v37 }
0x1071   :  { %v1374_v39 = vmul.f32 %v1371_v38, %v1371_v38 }
0x1073   :  { %v1381_v1 = vsel %vm120_vm2, %v1374_v39, 0.0 }
0x1074   :  { %1382 = vadd.xlane.f32.xlu1 %v1381_v1 }
0x10d7   :  { %v1377_v41 = vpop.xlane.xlu2 %1376 }
0x10d8   :  { %v1384_v42 = vmul.f32 %v1377_v41, %v2059_v14 }
0x10da   :  { %v1387_v44 = vadd.f32 1e-05, %v1384_v42 }
0x10dc   :  { %1779 = vrsqrt.f32 %v1387_v44  ;;  %vm1396_vm12 = vweird.f32 %v1387_v44 }
0x10df   :  { %v1380_v45 = vpop.xlane.xlu0 %1379 }
0x10e0   :  { %v1385_v46 = vmul.f32 %v1380_v45, %v2059_v14 }
0x10e2   :  { %v1780_v47 = vpop.eup %1779  ;;  %v1388_v33 = vadd.f32 1e-05, %v1385_v46 }
0x10e3   :  { %v1391_v48 = vmul.f32 %v1780_v47, %v1387_v44  ;;  %vm1397_vm7 = vweird.f32 %v1780_v47 }
0x10e4   :  { %1781 = vrsqrt.f32 %v1388_v33  ;;  %vm1398_vm13 = vmor %vm1396_vm12, %vm1397_vm7  ;;  %vm1406_vm15 = vweird.f32 %v1388_v33 }
0x10e5   :  { %v1392_v49 = vmul.f32 %v1780_v47, %v1391_v48 }
0x10e7   :  { %v1393_v50 = vmul.f32 0.5, %v1392_v49  ;;  %v1383_v51 = vpop.xlane.xlu1 %1382 }
0x10e8   :  { %v1386_v52 = vmul.f32 %v1383_v51, %v2059_v14 }
0x10e9   :  { %v1394_v53 = vsub.f32 1.5, %v1393_v50 }
0x10ea   :  { %v1782_v13 = vpop.eup %1781  ;;  %v1389_v54 = vadd.f32 1e-05, %v1386_v52 }
0x10eb   :  { %v1395_v55 = vmul.f32 %v1780_v47, %v1394_v53  ;;  %v1401_v56 = vmul.f32 %v1782_v13, %v1388_v33  ;;  %vm1407_vm14 = vweird.f32 %v1782_v13 }
0x10ec   :  { %1783 = vrsqrt.f32 %v1389_v54  ;;  %vm1408_vm1 = vmor %vm1406_vm15, %vm1407_vm14  ;;  %vm1416_vm3 = vweird.f32 %v1389_v54 }
0x10ed   :  { %v1402_v15 = vmul.f32 %v1782_v13, %v1401_v56  ;;  %v1399_v57 = vsel %vm1398_vm13, %v1780_v47, %v1395_v55 }
0x10ee   :  { %v1420_v61 = vmul.f32 %v1399_v57, %v1369_v26 }
0x10ef   :  { %v1403_v58 = vmul.f32 0.5, %v1402_v15 }
0x10f0   :  { %v1424_v0 = vmul.f32 %v1423_v16, %v1420_v61 }
0x10f1   :  { %v1404_v59 = vsub.f32 1.5, %v1403_v58 }
0x10f2   :  { %v1784_v60 = vpop.eup %1783  ;;  %v1428_v7 = vadd.f32 %v1427_v63, %v1424_v0 }
0x10f3   :  { %v1405_v18 = vmul.f32 %v1782_v13, %v1404_v59  ;;  %v1411_v14 = vmul.f32 %v1784_v60, %v1389_v54  ;;  %vm1417_vm0 = vweird.f32 %v1784_v60 }
0x10f4   :  { %vm1418_vm4 = vmor %vm1416_vm3, %vm1417_vm0 }
0x10f5   :  { %v1409_v62 = vsel %vm1408_vm1, %v1782_v13, %v1405_v18  ;;  %v1412_v22 = vmul.f32 %v1784_v60, %v1411_v14 }
0x10f6   :  { %v1421_v2 = vmul.f32 %v1409_v62, %v1370_v32 }
0x10f7   :  { %v1413_v4 = vmul.f32 0.5, %v1412_v22 }
0x10f8   :  { %v1425_v5 = vmul.f32 %v1423_v16, %v1421_v2 }
0x10f9   :  { %v1414_v6 = vsub.f32 1.5, %v1413_v4 }
0x10fa   :  { %v1429_v8 = vadd.f32 %v1427_v63, %v1425_v5 }
0x10fb   :  { %v1415_v9 = vmul.f32 %v1784_v60, %v1414_v6 }
0x10fc   :  { %v1431_v10 = vpack.c.bf16 %v1429_v8, %v1428_v7 }
0x10fd   :  { %v1419_v11 = vsel %vm1418_vm4, %v1784_v60, %v1415_v9 }
0x10fe   :  { %1644 = vmatmul.msk.bf16.vlgmr.msra.gmra.mxu2 %vm120_vm2, %v1431_v10  ;;  %v1422_v12 = vmul.f32 %v1419_v11, %v1371_v38 }
0x1100   :  { %v1426_v17 = vmul.f32 %v1423_v16, %v1422_v12 }
0x1102   :  { %v1430_v19 = vadd.f32 %v1427_v63, %v1426_v17 }
0x1104   :  { %v1432_v20 = vpack.c.bf16 %v1430_v19, %v1430_v19 }
0x110e   :  { %1645 = vmatmul.msk.bf16.gmra.mxu2 %vm120_vm2, %v1432_v20 }
0x1181   :  { %v1468_v3 = vpop.f32.mrf.mxu2 }
0x1182   :  { %v1469_v21 = vadd.f32 %v1694_v43, %v1468_v3 }
0x1184   :  { %1477 = vst [vmem:[#allocation5] sm:$0xff] %v1469_v21 }
0x1189   :  { %v1470_v23 = vpop.f32.mrf.mxu2 }
0x118a   :  { %v1471_v24 = vadd.f32 %v1694_v43, %v1470_v23 }
0x118c   :  { %1478 = vst [vmem:[#allocation5 + $0x8] sm:$0xff] %v1471_v24 }
0x1191   :  { %v1473_v25 = vpop.f32.mrf.mxu2 }
0x1192   :  { %v1474_v26 = vadd.f32 %v1694_v43, %v1473_v25 }
0x1194   :  { %1479 = vst [vmem:[#allocation5 + $0x10] sm:$0xff] %v1474_v26 }
0x1195   :  { %1492 = dma.vmem_to_hbm [thread:$0]  %s1485_s2, 384, %s1487_s19, [#allocation4], %s1847_s3, %s1847_s3, %s1848_s20  }
0x1199   :  { %v1475_v27 = vpop.f32.mrf.mxu2 }
0x119a   :  { %1835 = dma.done.wait [#allocation4], 384  }
0x119b   :  { %1836 = vsyncadd [#allocation4], 4294966912 }
0x119c   :  { %1497 = vsyncpa [#allocation3], 1 }
0x119d   :  { %1498 = vsyncpa [#allocation4], 1 }

</bundles_post_ra>
